<compile_context>
chip_gen: v5e
topology: v5e:2x2
jax: 0.10.0
libtpu: 0.0.40
codegen_flags: <defaults>
</compile_context>

<pallas_src>
import functools

import jax
import jax.numpy as jnp
from jax.experimental import pallas as pl
from jax.experimental.pallas import tpu as pltpu


def _attention_kernel(xq_ref, xkv_ref, wq_ref, bq_ref, wkv_ref, bkv_ref,
                      wproj_ref, bproj_ref, o_ref,
                      *, n_heads, head_dim, scale, batched_heads):
    """One (batch, query-tile) grid step.

    xq_ref:    (1, TQ, D)  query tile of x            (compute dtype, e.g. bf16)
    xkv_ref:   (1, N, D)   full sequence (for K/V)    (compute dtype)
    wq_ref:    (D, D)      Q projection weights       (compute dtype)
    bq_ref:    (1, D)      Q bias                     (f32)
    wkv_ref:   (D, 2D)     fused K/V projection       (compute dtype)
    bkv_ref:   (1, 2D)     K/V bias                   (f32)
    wproj_ref: (D, D)      output projection          (compute dtype)
    bproj_ref: (1, D)      output bias                (f32)
    o_ref:     (1, TQ, D)  output tile                (x.dtype)
    """
    dim = n_heads * head_dim
    cd = wq_ref.dtype                                   # compute dtype (bf16)

    xq = xq_ref[0]                                      # (TQ, D)
    xkv = xkv_ref[0]                                    # (N, D)

    # --- projections (MXU, bf16 inputs, f32 accumulation) ---
    q = jnp.dot(xq, wq_ref[...], preferred_element_type=jnp.float32)
    q = (q + bq_ref[0]) * scale                         # (TQ, D) f32, scale folded here
    kv = jnp.dot(xkv, wkv_ref[...], preferred_element_type=jnp.float32)
    kv = kv + bkv_ref[0]                                # (N, 2D) f32
    k = kv[:, :dim]                                     # lane-aligned slab when D%128==0
    v = kv[:, dim:]

    tq = q.shape[0]
    n = k.shape[0]

    if batched_heads:
        # (T, D) -> (H, T, hd): batch the heads so the MXU sees back-to-back matmuls.
        qh = jnp.transpose(q.reshape(tq, n_heads, head_dim), (1, 0, 2)).astype(cd)
        kh = jnp.transpose(k.reshape(n, n_heads, head_dim), (1, 0, 2)).astype(cd)
        vh = jnp.transpose(v.reshape(n, n_heads, head_dim), (1, 0, 2)).astype(cd)

        s = jnp.einsum('hqd,hkd->hqk', qh, kh,
                       preferred_element_type=jnp.float32)        # (H, TQ, N) f32
        m = jnp.max(s, axis=-1, keepdims=True)
        e = jnp.exp(s - m)
        denom = jnp.sum(e, axis=-1, keepdims=True)
        p = e * pl.reciprocal(denom, approx=True)                 # EUP vrcp

        wa = jnp.einsum('hqk,hkd->hqd', p.astype(cd), vh,
                        preferred_element_type=jnp.float32)       # (H, TQ, hd) f32
        weighted = jnp.transpose(wa, (1, 0, 2)).reshape(tq, dim)  # (TQ, D) f32
    else:
        # Fallback: static per-head loop (always lowers). Matches torch's
        # transpose(1, 2).flatten(2) ordering via last-axis concatenation.
        outs = []
        for h in range(n_heads):
            qh = q[:, h * head_dim:(h + 1) * head_dim].astype(cd)
            kh = k[:, h * head_dim:(h + 1) * head_dim].astype(cd)
            vh = v[:, h * head_dim:(h + 1) * head_dim].astype(cd)
            s = jnp.einsum('qd,kd->qk', qh, kh,
                           preferred_element_type=jnp.float32)    # (TQ, N) f32
            m = jnp.max(s, axis=-1, keepdims=True)
            e = jnp.exp(s - m)
            denom = jnp.sum(e, axis=-1, keepdims=True)
            p = e * pl.reciprocal(denom, approx=True)
            outs.append(jnp.dot(p.astype(cd), vh,
                                preferred_element_type=jnp.float32))
        weighted = jnp.concatenate(outs, axis=-1)                 # (TQ, D) f32

    # --- output projection ---
    y = jnp.dot(weighted.astype(cd), wproj_ref[...],
                preferred_element_type=jnp.float32)
    y = y + bproj_ref[0]
    o_ref[0] = y.astype(o_ref.dtype)


def _attention_pallas(x, w_qkv, b_qkv, w_proj, b_proj, n_heads, *,
                      compute_dtype, batched_heads):
    B, N, D = x.shape
    head_dim = D // n_heads
    scale = head_dim ** (-0.5)

    # Query tile: up to 128 rows (multiple of 8 sublanes), must divide N.
    TQ = min(N, 128)
    if N % TQ != 0:
        TQ = N
    n_qt = N // TQ

    # Cast matmul operands to the compute dtype outside the kernel (halves weight DMA);
    # biases stay f32 (added post-accumulation).
    xc = x.astype(compute_dtype)
    w_q = w_qkv[:, :D].astype(compute_dtype)          # (D, D)
    w_kv = w_qkv[:, D:].astype(compute_dtype)         # (D, 2D)
    b_q = b_qkv[:D].astype(jnp.float32).reshape(1, D)
    b_kv = b_qkv[D:].astype(jnp.float32).reshape(1, 2 * D)
    w_p = w_proj.astype(compute_dtype)                # (D, D)
    b_p = b_proj.astype(jnp.float32).reshape(1, D)

    kernel = functools.partial(_attention_kernel, n_heads=n_heads,
                               head_dim=head_dim, scale=scale,
                               batched_heads=batched_heads)

    # Advisory cost estimate so XLA schedules surrounding ops sensibly.
    flops = (2 * B * N * D * (3 * D)        # QKV projections
             + 4 * B * N * N * D            # scores + attn@V
             + 2 * B * N * D * D)           # output projection
    transcendentals = B * n_heads * N * N   # exp in softmax
    itemsize = jnp.dtype(compute_dtype).itemsize
    bytes_accessed = (2 * B * N * D * itemsize                    # x (query tile + K/V view)
                      + (D * D + D * 2 * D + D * D) * itemsize    # weights
                      + (4 * D) * 4                               # biases (f32)
                      + B * N * D * jnp.dtype(x.dtype).itemsize)  # output

    return pl.pallas_call(
        kernel,
        out_shape=jax.ShapeDtypeStruct((B, N, D), x.dtype),
        grid_spec=pltpu.PrefetchScalarGridSpec(
            num_scalar_prefetch=0,
            grid=(B, n_qt),
            in_specs=[
                pl.BlockSpec((1, TQ, D), lambda b, t: (b, t, 0)),     # query tile
                pl.BlockSpec((1, N, D), lambda b, t: (b, 0, 0)),      # full seq for K/V
                pl.BlockSpec((D, D), lambda b, t: (0, 0)),            # w_q   (grid-invariant)
                pl.BlockSpec((1, D), lambda b, t: (0, 0)),            # b_q
                pl.BlockSpec((D, 2 * D), lambda b, t: (0, 0)),        # w_kv
                pl.BlockSpec((1, 2 * D), lambda b, t: (0, 0)),        # b_kv
                pl.BlockSpec((D, D), lambda b, t: (0, 0)),            # w_proj
                pl.BlockSpec((1, D), lambda b, t: (0, 0)),            # b_proj
            ],
            out_specs=pl.BlockSpec((1, TQ, D), lambda b, t: (b, t, 0)),
        ),
        compiler_params=pltpu.CompilerParams(
            dimension_semantics=("parallel", "parallel"),
            vmem_limit_bytes=64 * 1024 * 1024),
        cost_estimate=pl.CostEstimate(flops=flops,
                                      transcendentals=transcendentals,
                                      bytes_accessed=bytes_accessed),
    )(xc, xc, w_q, b_q, w_kv, b_kv, w_p, b_p)


def attention_forward(x, w_qkv, b_qkv, w_proj, b_proj, n_heads,
                      compute_dtype=jnp.bfloat16):
    """x: (B, N, D); w_qkv: (D, 3D); b_qkv: (3D,); w_proj: (D, D); b_proj: (D,)."""
    try:
        out = _attention_pallas(x, w_qkv, b_qkv, w_proj, b_proj, n_heads,
                                compute_dtype=compute_dtype, batched_heads=True)
        jax.block_until_ready(out)
        return out
    except Exception:
        # Defensive fallback: per-head loop formulation (guaranteed-to-lower baseline)
        # if the batched-head relayout path is not supported by this Mosaic build.
        return _attention_pallas(x, w_qkv, b_qkv, w_proj, b_proj, n_heads,
                                 compute_dtype=compute_dtype, batched_heads=False)


def attention_reference(x, w_qkv, b_qkv, w_proj, b_proj, n_heads):
    """Pure-JAX f32 reference mirroring the PyTorch forward (eval mode)."""
    B, N, D = x.shape
    hd = D // n_heads
    scale = hd ** (-0.5)
    qkv = jnp.einsum('bnd,de->bne', x, w_qkv) + b_qkv            # (B, N, 3D)
    qkv = qkv.reshape(B, N, 3, n_heads, hd)
    q, k, v = jnp.transpose(qkv, (2, 0, 3, 1, 4))                # (B, H, N, hd)
    dp = jnp.einsum('bhqd,bhkd->bhqk', q, k) * scale
    attn = jax.nn.softmax(dp, axis=-1)
    wa = jnp.einsum('bhqk,bhkd->bhqd', attn, v)                  # (B, H, N, hd)
    wa = jnp.transpose(wa, (0, 2, 1, 3)).reshape(B, N, D)
    return jnp.einsum('bnd,de->bne', wa, w_proj) + b_proj


if __name__ == "__main__":
    # Small shapes consistent with the module: dim divisible by n_heads.
    B, N, D = 2, 8, 32
    n_heads = 8

    key = jax.random.PRNGKey(0)
    k_x, k_wqkv, k_bqkv, k_wproj, k_bproj = jax.random.split(key, 5)

    x = jax.random.normal(k_x, (B, N, D), dtype=jnp.float32)
    # nn.Linear(dim, 3*dim): weight (3D, D) -> pass transposed (D, 3D).
    w_qkv = jax.random.normal(k_wqkv, (D, 3 * D), dtype=jnp.float32) * 0.05
    b_qkv = jax.random.normal(k_bqkv, (3 * D,), dtype=jnp.float32) * 0.05
    # nn.Linear(dim, dim): weight (D, D) -> pass transposed (D, D).
    w_proj = jax.random.normal(k_wproj, (D, D), dtype=jnp.float32) * 0.05
    b_proj = jax.random.normal(k_bproj, (D,), dtype=jnp.float32) * 0.05

    out = attention_forward(x, w_qkv, b_qkv, w_proj, b_proj, n_heads)
    out = jax.block_until_ready(out)

    ref = attention_reference(x, w_qkv, b_qkv, w_proj, b_proj, n_heads)
    assert out.shape == (B, N, D)
    # Tolerance loosened vs. the pure-f32 version: matmul inputs are bf16 (f32 accumulate).
    assert jnp.allclose(out, ref, atol=2e-2, rtol=2e-2), "mismatch vs reference"

    print("KERNEL_OK")
</pallas_src>

<mosaic_0001>
module attributes {stable_mosaic.version = 11 : i64} {
  func.func @_attention_kernel(%arg0: i32, %arg1: i32, %arg2: memref<1x8x32xbf16, #tpu.memory_space<vmem>>, %arg3: memref<1x8x32xbf16, #tpu.memory_space<vmem>>, %arg4: memref<32x32xbf16, #tpu.memory_space<vmem>>, %arg5: memref<1x32xf32, #tpu.memory_space<vmem>>, %arg6: memref<32x64xbf16, #tpu.memory_space<vmem>>, %arg7: memref<1x64xf32, #tpu.memory_space<vmem>>, %arg8: memref<32x32xbf16, #tpu.memory_space<vmem>>, %arg9: memref<1x32xf32, #tpu.memory_space<vmem>>, %arg10: memref<1x8x32xf32, #tpu.memory_space<vmem>>) attributes {dimension_semantics = [#tpu.dimension_semantics<parallel>, #tpu.dimension_semantics<parallel>], iteration_bounds = array<i64: 2, 1>, scalar_prefetch = 0 : i64, scratch_operands = 0 : i64, tpu.core_type = #tpu.core_type<tc>, window_params = [{transform_indices = @transform_0, window_bounds = array<i64: 1, 8, 32>}, {transform_indices = @transform_1, window_bounds = array<i64: 1, 8, 32>}, {pipeline_mode = #tpu.pipeline_mode<synchronous>, transform_indices = @transform_2, window_bounds = array<i64: 32, 32>}, {pipeline_mode = #tpu.pipeline_mode<synchronous>, transform_indices = @transform_3, window_bounds = array<i64: 1, 32>}, {pipeline_mode = #tpu.pipeline_mode<synchronous>, transform_indices = @transform_4, window_bounds = array<i64: 32, 64>}, {pipeline_mode = #tpu.pipeline_mode<synchronous>, transform_indices = @transform_5, window_bounds = array<i64: 1, 64>}, {pipeline_mode = #tpu.pipeline_mode<synchronous>, transform_indices = @transform_6, window_bounds = array<i64: 32, 32>}, {pipeline_mode = #tpu.pipeline_mode<synchronous>, transform_indices = @transform_7, window_bounds = array<i64: 1, 32>}, {transform_indices = @transform_8, window_bounds = array<i64: 1, 8, 32>}]} {
    %c0 = arith.constant 0 : index
    %c0_0 = arith.constant 0 : index
    %c0_1 = arith.constant 0 : index
    %0 = vector.load %arg2[%c0, %c0_0, %c0_1] : memref<1x8x32xbf16, #tpu.memory_space<vmem>>, vector<1x8x32xbf16>
    %1 = vector.shape_cast %0 : vector<1x8x32xbf16> to vector<8x32xbf16>
    %c0_2 = arith.constant 0 : index
    %c0_3 = arith.constant 0 : index
    %c0_4 = arith.constant 0 : index
    %2 = vector.load %arg3[%c0_2, %c0_3, %c0_4] : memref<1x8x32xbf16, #tpu.memory_space<vmem>>, vector<1x8x32xbf16>
    %3 = vector.shape_cast %2 : vector<1x8x32xbf16> to vector<8x32xbf16>
    %c0_5 = arith.constant 0 : index
    %c0_6 = arith.constant 0 : index
    %4 = vector.load %arg4[%c0_5, %c0_6] : memref<32x32xbf16, #tpu.memory_space<vmem>>, vector<32x32xbf16>
    %cst = arith.constant dense<0.000000e+00> : vector<8x32xf32>
    %5 = tpu.matmul %1, %4, %cst {dimension_numbers = #tpu.dot_dimension_numbers<[1], [0], [0], [1], [0, 0, 1, 1], [], []>} : vector<8x32xbf16>, vector<32x32xbf16>, vector<8x32xf32> -> vector<8x32xf32>
    %c0_7 = arith.constant 0 : index
    %c0_8 = arith.constant 0 : index
    %6 = vector.load %arg5[%c0_7, %c0_8] : memref<1x32xf32, #tpu.memory_space<vmem>>, vector<1x32xf32>
    %7 = vector.shape_cast %6 : vector<1x32xf32> to vector<32xf32>
    %8 = vector.shape_cast %7 : vector<32xf32> to vector<1x32xf32>
    %9 = vector.broadcast %8 : vector<1x32xf32> to vector<8x32xf32>
    %10 = arith.addf %5, %9 : vector<8x32xf32>
    %cst_9 = arith.constant 5.000000e-01 : f32
    %11 = vector.broadcast %cst_9 : f32 to vector<8x32xf32>
    %12 = arith.mulf %10, %11 : vector<8x32xf32>
    %c0_10 = arith.constant 0 : index
    %c0_11 = arith.constant 0 : index
    %13 = vector.load %arg6[%c0_10, %c0_11] : memref<32x64xbf16, #tpu.memory_space<vmem>>, vector<32x64xbf16>
    %cst_12 = arith.constant dense<0.000000e+00> : vector<8x64xf32>
    %14 = tpu.matmul %3, %13, %cst_12 {dimension_numbers = #tpu.dot_dimension_numbers<[1], [0], [0], [1], [0, 0, 1, 1], [], []>} : vector<8x32xbf16>, vector<32x64xbf16>, vector<8x64xf32> -> vector<8x64xf32>
    %c0_13 = arith.constant 0 : index
    %c0_14 = arith.constant 0 : index
    %15 = vector.load %arg7[%c0_13, %c0_14] : memref<1x64xf32, #tpu.memory_space<vmem>>, vector<1x64xf32>
    %16 = vector.shape_cast %15 : vector<1x64xf32> to vector<64xf32>
    %17 = vector.shape_cast %16 : vector<64xf32> to vector<1x64xf32>
    %18 = vector.broadcast %17 : vector<1x64xf32> to vector<8x64xf32>
    %19 = arith.addf %14, %18 : vector<8x64xf32>
    %20 = vector.extract_strided_slice %19 {offsets = [0, 0], sizes = [8, 32], strides = [1, 1]} : vector<8x64xf32> to vector<8x32xf32>
    %21 = vector.extract_strided_slice %19 {offsets = [0, 32], sizes = [8, 32], strides = [1, 1]} : vector<8x64xf32> to vector<8x32xf32>
    %22 = vector.shape_cast %12 : vector<8x32xf32> to vector<8x8x4xf32>
    %23 = tpu.transpose %22, [1, 0, 2] : vector<8x8x4xf32> -> vector<8x8x4xf32>
    %24 = arith.truncf %23 : vector<8x8x4xf32> to vector<8x8x4xbf16>
    %25 = vector.shape_cast %20 : vector<8x32xf32> to vector<8x8x4xf32>
    %26 = tpu.transpose %25, [1, 0, 2] : vector<8x8x4xf32> -> vector<8x8x4xf32>
    %27 = arith.truncf %26 : vector<8x8x4xf32> to vector<8x8x4xbf16>
    %28 = vector.shape_cast %21 : vector<8x32xf32> to vector<8x8x4xf32>
    %29 = tpu.transpose %28, [1, 0, 2] : vector<8x8x4xf32> -> vector<8x8x4xf32>
    %30 = arith.truncf %29 : vector<8x8x4xf32> to vector<8x8x4xbf16>
    "tpu.trace_start"() <{level = 10 : i32, message = "hqd,hkd->hqk"}> : () -> ()
    %cst_15 = arith.constant dense<0.000000e+00> : vector<8x8x8xf32>
    %31 = tpu.matmul %24, %27, %cst_15 {dimension_numbers = #tpu.dot_dimension_numbers<[2], [2], [1], [1], [0, 0, 0, 1, 1, 1], [0], [0]>} : vector<8x8x4xbf16>, vector<8x8x4xbf16>, vector<8x8x8xf32> -> vector<8x8x8xf32>
    "tpu.trace_stop"() : () -> ()
    %cst_16 = arith.constant dense<0xFF800000> : vector<8x8xf32>
    %32 = vector.multi_reduction <maximumf>, %31, %cst_16 [2] : vector<8x8x8xf32> to vector<8x8xf32>
    %33 = vector.shape_cast %32 : vector<8x8xf32> to vector<8x8x1xf32>
    %34 = vector.broadcast %33 : vector<8x8x1xf32> to vector<8x8x8xf32>
    %35 = arith.subf %31, %34 : vector<8x8x8xf32>
    %36 = math.exp %35 : vector<8x8x8xf32>
    %cst_17 = arith.constant dense<0.000000e+00> : vector<8x8xf32>
    %37 = vector.multi_reduction <add>, %36, %cst_17 [2] : vector<8x8x8xf32> to vector<8x8xf32>
    %38 = vector.shape_cast %37 : vector<8x8xf32> to vector<8x8x1xf32>
    %39 = tpu.reciprocal %38 {approx = true} : vector<8x8x1xf32> -> vector<8x8x1xf32>
    %40 = vector.broadcast %39 : vector<8x8x1xf32> to vector<8x8x8xf32>
    %41 = arith.mulf %36, %40 : vector<8x8x8xf32>
    %42 = arith.truncf %41 : vector<8x8x8xf32> to vector<8x8x8xbf16>
    "tpu.trace_start"() <{level = 10 : i32, message = "hqk,hkd->hqd"}> : () -> ()
    %cst_18 = arith.constant dense<0.000000e+00> : vector<8x8x4xf32>
    %43 = tpu.matmul %42, %30, %cst_18 {dimension_numbers = #tpu.dot_dimension_numbers<[2], [1], [1], [2], [0, 0, 0, 1, 1, 2], [0], [0]>} : vector<8x8x8xbf16>, vector<8x8x4xbf16>, vector<8x8x4xf32> -> vector<8x8x4xf32>
    "tpu.trace_stop"() : () -> ()
    %44 = tpu.transpose %43, [1, 0, 2] : vector<8x8x4xf32> -> vector<8x8x4xf32>
    %45 = vector.shape_cast %44 : vector<8x8x4xf32> to vector<8x32xf32>
    %46 = arith.truncf %45 : vector<8x32xf32> to vector<8x32xbf16>
    %c0_19 = arith.constant 0 : index
    %c0_20 = arith.constant 0 : index
    %47 = vector.load %arg8[%c0_19, %c0_20] : memref<32x32xbf16, #tpu.memory_space<vmem>>, vector<32x32xbf16>
    %cst_21 = arith.constant dense<0.000000e+00> : vector<8x32xf32>
    %48 = tpu.matmul %46, %47, %cst_21 {dimension_numbers = #tpu.dot_dimension_numbers<[1], [0], [0], [1], [0, 0, 1, 1], [], []>} : vector<8x32xbf16>, vector<32x32xbf16>, vector<8x32xf32> -> vector<8x32xf32>
    %c0_22 = arith.constant 0 : index
    %c0_23 = arith.constant 0 : index
    %49 = vector.load %arg9[%c0_22, %c0_23] : memref<1x32xf32, #tpu.memory_space<vmem>>, vector<1x32xf32>
    %50 = vector.shape_cast %49 : vector<1x32xf32> to vector<32xf32>
    %51 = vector.shape_cast %50 : vector<32xf32> to vector<1x32xf32>
    %52 = vector.broadcast %51 : vector<1x32xf32> to vector<8x32xf32>
    %53 = arith.addf %48, %52 : vector<8x32xf32>
    %c0_24 = arith.constant 0 : index
    %c0_25 = arith.constant 0 : index
    %c0_26 = arith.constant 0 : index
    %54 = vector.load %arg10[%c0_24, %c0_25, %c0_26] : memref<1x8x32xf32, #tpu.memory_space<vmem>>, vector<1x8x32xf32>
    %55 = vector.shape_cast %54 : vector<1x8x32xf32> to vector<8x32xf32>
    %56 = vector.shape_cast %53 : vector<8x32xf32> to vector<1x8x32xf32>
    tpu.vector_store %arg10[%c0_24, %c0_25, %c0_26], %56 {strides = array<i32>} : memref<1x8x32xf32, #tpu.memory_space<vmem>>, vector<1x8x32xf32>,
    return
  }
  func.func @transform_0(%arg0: i32, %arg1: i32) -> (i32, i32, i32) {
    %c0_i32 = arith.constant 0 : i32
    %c0_i32_0 = arith.constant 0 : i32
    return %arg0, %arg1, %c0_i32 : i32, i32, i32
  }
  func.func @transform_1(%arg0: i32, %arg1: i32) -> (i32, i32, i32) {
    %c0_i32 = arith.constant 0 : i32
    %c0_i32_0 = arith.constant 0 : i32
    %c0_i32_1 = arith.constant 0 : i32
    return %arg0, %c0_i32, %c0_i32_0 : i32, i32, i32
  }
  func.func @transform_2(%arg0: i32, %arg1: i32) -> (i32, i32) {
    %c0_i32 = arith.constant 0 : i32
    %c0_i32_0 = arith.constant 0 : i32
    %c0_i32_1 = arith.constant 0 : i32
    return %c0_i32, %c0_i32_0 : i32, i32
  }
  func.func @transform_3(%arg0: i32, %arg1: i32) -> (i32, i32) {
    %c0_i32 = arith.constant 0 : i32
    %c0_i32_0 = arith.constant 0 : i32
    %c0_i32_1 = arith.constant 0 : i32
    return %c0_i32, %c0_i32_0 : i32, i32
  }
  func.func @transform_4(%arg0: i32, %arg1: i32) -> (i32, i32) {
    %c0_i32 = arith.constant 0 : i32
    %c0_i32_0 = arith.constant 0 : i32
    %c0_i32_1 = arith.constant 0 : i32
    return %c0_i32, %c0_i32_0 : i32, i32
  }
  func.func @transform_5(%arg0: i32, %arg1: i32) -> (i32, i32) {
    %c0_i32 = arith.constant 0 : i32
    %c0_i32_0 = arith.constant 0 : i32
    %c0_i32_1 = arith.constant 0 : i32
    return %c0_i32, %c0_i32_0 : i32, i32
  }
  func.func @transform_6(%arg0: i32, %arg1: i32) -> (i32, i32) {
    %c0_i32 = arith.constant 0 : i32
    %c0_i32_0 = arith.constant 0 : i32
    %c0_i32_1 = arith.constant 0 : i32
    return %c0_i32, %c0_i32_0 : i32, i32
  }
  func.func @transform_7(%arg0: i32, %arg1: i32) -> (i32, i32) {
    %c0_i32 = arith.constant 0 : i32
    %c0_i32_0 = arith.constant 0 : i32
    %c0_i32_1 = arith.constant 0 : i32
    return %c0_i32, %c0_i32_0 : i32, i32
  }
  func.func @transform_8(%arg0: i32, %arg1: i32) -> (i32, i32, i32) {
    %c0_i32 = arith.constant 0 : i32
    %c0_i32_0 = arith.constant 0 : i32
    return %arg0, %arg1, %c0_i32 : i32, i32, i32
  }
}

module attributes {stable_mosaic.version = 11 : i64} {
  func.func @_attention_kernel(%arg0: i32, %arg1: i32, %arg2: memref<1x8x32xbf16, #tpu.memory_space<vmem>>, %arg3: memref<1x8x32xbf16, #tpu.memory_space<vmem>>, %arg4: memref<32x32xbf16, #tpu.memory_space<vmem>>, %arg5: memref<1x32xf32, #tpu.memory_space<vmem>>, %arg6: memref<32x64xbf16, #tpu.memory_space<vmem>>, %arg7: memref<1x64xf32, #tpu.memory_space<vmem>>, %arg8: memref<32x32xbf16, #tpu.memory_space<vmem>>, %arg9: memref<1x32xf32, #tpu.memory_space<vmem>>, %arg10: memref<1x8x32xf32, #tpu.memory_space<vmem>>) attributes {dimension_semantics = [#tpu.dimension_semantics<parallel>, #tpu.dimension_semantics<parallel>], iteration_bounds = array<i64: 2, 1>, scalar_prefetch = 0 : i64, scratch_operands = 0 : i64, tpu.core_type = #tpu.core_type<tc>, window_params = [{transform_indices = @transform_0, window_bounds = array<i64: 1, 8, 32>}, {transform_indices = @transform_1, window_bounds = array<i64: 1, 8, 32>}, {pipeline_mode = #tpu.pipeline_mode<synchronous>, transform_indices = @transform_2, window_bounds = array<i64: 32, 32>}, {pipeline_mode = #tpu.pipeline_mode<synchronous>, transform_indices = @transform_3, window_bounds = array<i64: 1, 32>}, {pipeline_mode = #tpu.pipeline_mode<synchronous>, transform_indices = @transform_4, window_bounds = array<i64: 32, 64>}, {pipeline_mode = #tpu.pipeline_mode<synchronous>, transform_indices = @transform_5, window_bounds = array<i64: 1, 64>}, {pipeline_mode = #tpu.pipeline_mode<synchronous>, transform_indices = @transform_6, window_bounds = array<i64: 32, 32>}, {pipeline_mode = #tpu.pipeline_mode<synchronous>, transform_indices = @transform_7, window_bounds = array<i64: 1, 32>}, {transform_indices = @transform_8, window_bounds = array<i64: 1, 8, 32>}]} {
    %c0 = arith.constant 0 : index
    %c0_0 = arith.constant 0 : index
    %c0_1 = arith.constant 0 : index
    %0 = vector.load %arg2[%c0, %c0_0, %c0_1] : memref<1x8x32xbf16, #tpu.memory_space<vmem>>, vector<1x8x32xbf16>
    %1 = vector.shape_cast %0 : vector<1x8x32xbf16> to vector<8x32xbf16>
    %c0_2 = arith.constant 0 : index
    %c0_3 = arith.constant 0 : index
    %c0_4 = arith.constant 0 : index
    %2 = vector.load %arg3[%c0_2, %c0_3, %c0_4] : memref<1x8x32xbf16, #tpu.memory_space<vmem>>, vector<1x8x32xbf16>
    %3 = vector.shape_cast %2 : vector<1x8x32xbf16> to vector<8x32xbf16>
    %c0_5 = arith.constant 0 : index
    %c0_6 = arith.constant 0 : index
    %4 = vector.load %arg4[%c0_5, %c0_6] : memref<32x32xbf16, #tpu.memory_space<vmem>>, vector<32x32xbf16>
    %cst = arith.constant dense<0.000000e+00> : vector<8x32xf32>
    %5 = tpu.matmul %1, %4, %cst {dimension_numbers = #tpu.dot_dimension_numbers<[1], [0], [0], [1], [0, 0, 1, 1], [], []>} : vector<8x32xbf16>, vector<32x32xbf16>, vector<8x32xf32> -> vector<8x32xf32>
    %c0_7 = arith.constant 0 : index
    %c0_8 = arith.constant 0 : index
    %6 = vector.load %arg5[%c0_7, %c0_8] : memref<1x32xf32, #tpu.memory_space<vmem>>, vector<1x32xf32>
    %7 = vector.shape_cast %6 : vector<1x32xf32> to vector<32xf32>
    %8 = vector.shape_cast %7 : vector<32xf32> to vector<1x32xf32>
    %9 = vector.broadcast %8 : vector<1x32xf32> to vector<8x32xf32>
    %10 = arith.addf %5, %9 : vector<8x32xf32>
    %cst_9 = arith.constant 5.000000e-01 : f32
    %11 = vector.broadcast %cst_9 : f32 to vector<8x32xf32>
    %12 = arith.mulf %10, %11 : vector<8x32xf32>
    %c0_10 = arith.constant 0 : index
    %c0_11 = arith.constant 0 : index
    %13 = vector.load %arg6[%c0_10, %c0_11] : memref<32x64xbf16, #tpu.memory_space<vmem>>, vector<32x64xbf16>
    %cst_12 = arith.constant dense<0.000000e+00> : vector<8x64xf32>
    %14 = tpu.matmul %3, %13, %cst_12 {dimension_numbers = #tpu.dot_dimension_numbers<[1], [0], [0], [1], [0, 0, 1, 1], [], []>} : vector<8x32xbf16>, vector<32x64xbf16>, vector<8x64xf32> -> vector<8x64xf32>
    %c0_13 = arith.constant 0 : index
    %c0_14 = arith.constant 0 : index
    %15 = vector.load %arg7[%c0_13, %c0_14] : memref<1x64xf32, #tpu.memory_space<vmem>>, vector<1x64xf32>
    %16 = vector.shape_cast %15 : vector<1x64xf32> to vector<64xf32>
    %17 = vector.shape_cast %16 : vector<64xf32> to vector<1x64xf32>
    %18 = vector.broadcast %17 : vector<1x64xf32> to vector<8x64xf32>
    %19 = arith.addf %14, %18 : vector<8x64xf32>
    %20 = vector.extract_strided_slice %19 {offsets = [0, 0], sizes = [8, 32], strides = [1, 1]} : vector<8x64xf32> to vector<8x32xf32>
    %21 = vector.extract_strided_slice %19 {offsets = [0, 32], sizes = [8, 32], strides = [1, 1]} : vector<8x64xf32> to vector<8x32xf32>
    %22 = vector.extract_strided_slice %12 {offsets = [0, 0], sizes = [8, 4], strides = [1, 1]} : vector<8x32xf32> to vector<8x4xf32>
    %23 = arith.truncf %22 : vector<8x4xf32> to vector<8x4xbf16>
    %24 = vector.extract_strided_slice %20 {offsets = [0, 0], sizes = [8, 4], strides = [1, 1]} : vector<8x32xf32> to vector<8x4xf32>
    %25 = arith.truncf %24 : vector<8x4xf32> to vector<8x4xbf16>
    %26 = vector.extract_strided_slice %21 {offsets = [0, 0], sizes = [8, 4], strides = [1, 1]} : vector<8x32xf32> to vector<8x4xf32>
    %27 = arith.truncf %26 : vector<8x4xf32> to vector<8x4xbf16>
    "tpu.trace_start"() <{level = 10 : i32, message = "qd,kd->qk"}> : () -> ()
    %cst_15 = arith.constant dense<0.000000e+00> : vector<8x8xf32>
    %28 = tpu.matmul %23, %25, %cst_15 {dimension_numbers = #tpu.dot_dimension_numbers<[1], [1], [0], [0], [0, 0, 1, 0], [], []>} : vector<8x4xbf16>, vector<8x4xbf16>, vector<8x8xf32> -> vector<8x8xf32>
    "tpu.trace_stop"() : () -> ()
    %cst_16 = arith.constant dense<0xFF800000> : vector<8xf32>
    %29 = vector.multi_reduction <maximumf>, %28, %cst_16 [1] : vector<8x8xf32> to vector<8xf32>
    %30 = vector.shape_cast %29 : vector<8xf32> to vector<8x1xf32>
    %31 = vector.broadcast %30 : vector<8x1xf32> to vector<8x8xf32>
    %32 = arith.subf %28, %31 : vector<8x8xf32>
    %33 = math.exp %32 : vector<8x8xf32>
    %cst_17 = arith.constant dense<0.000000e+00> : vector<8xf32>
    %34 = vector.multi_reduction <add>, %33, %cst_17 [1] : vector<8x8xf32> to vector<8xf32>
    %35 = vector.shape_cast %34 : vector<8xf32> to vector<8x1xf32>
    %36 = tpu.reciprocal %35 {approx = true} : vector<8x1xf32> -> vector<8x1xf32>
    %37 = vector.broadcast %36 : vector<8x1xf32> to vector<8x8xf32>
    %38 = arith.mulf %33, %37 : vector<8x8xf32>
    %39 = arith.truncf %38 : vector<8x8xf32> to vector<8x8xbf16>
    %cst_18 = arith.constant dense<0.000000e+00> : vector<8x4xf32>
    %40 = tpu.matmul %39, %27, %cst_18 {dimension_numbers = #tpu.dot_dimension_numbers<[1], [0], [0], [1], [0, 0, 1, 1], [], []>} : vector<8x8xbf16>, vector<8x4xbf16>, vector<8x4xf32> -> vector<8x4xf32>
    %41 = vector.extract_strided_slice %12 {offsets = [0, 4], sizes = [8, 4], strides = [1, 1]} : vector<8x32xf32> to vector<8x4xf32>
    %42 = arith.truncf %41 : vector<8x4xf32> to vector<8x4xbf16>
    %43 = vector.extract_strided_slice %20 {offsets = [0, 4], sizes = [8, 4], strides = [1, 1]} : vector<8x32xf32> to vector<8x4xf32>
    %44 = arith.truncf %43 : vector<8x4xf32> to vector<8x4xbf16>
    %45 = vector.extract_strided_slice %21 {offsets = [0, 4], sizes = [8, 4], strides = [1, 1]} : vector<8x32xf32> to vector<8x4xf32>
    %46 = arith.truncf %45 : vector<8x4xf32> to vector<8x4xbf16>
    "tpu.trace_start"() <{level = 10 : i32, message = "qd,kd->qk"}> : () -> ()
    %cst_19 = arith.constant dense<0.000000e+00> : vector<8x8xf32>
    %47 = tpu.matmul %42, %44, %cst_19 {dimension_numbers = #tpu.dot_dimension_numbers<[1], [1], [0], [0], [0, 0, 1, 0], [], []>} : vector<8x4xbf16>, vector<8x4xbf16>, vector<8x8xf32> -> vector<8x8xf32>
    "tpu.trace_stop"() : () -> ()
    %cst_20 = arith.constant dense<0xFF800000> : vector<8xf32>
    %48 = vector.multi_reduction <maximumf>, %47, %cst_20 [1] : vector<8x8xf32> to vector<8xf32>
    %49 = vector.shape_cast %48 : vector<8xf32> to vector<8x1xf32>
    %50 = vector.broadcast %49 : vector<8x1xf32> to vector<8x8xf32>
    %51 = arith.subf %47, %50 : vector<8x8xf32>
    %52 = math.exp %51 : vector<8x8xf32>
    %cst_21 = arith.constant dense<0.000000e+00> : vector<8xf32>
    %53 = vector.multi_reduction <add>, %52, %cst_21 [1] : vector<8x8xf32> to vector<8xf32>
    %54 = vector.shape_cast %53 : vector<8xf32> to vector<8x1xf32>
    %55 = tpu.reciprocal %54 {approx = true} : vector<8x1xf32> -> vector<8x1xf32>
    %56 = vector.broadcast %55 : vector<8x1xf32> to vector<8x8xf32>
    %57 = arith.mulf %52, %56 : vector<8x8xf32>
    %58 = arith.truncf %57 : vector<8x8xf32> to vector<8x8xbf16>
    %cst_22 = arith.constant dense<0.000000e+00> : vector<8x4xf32>
    %59 = tpu.matmul %58, %46, %cst_22 {dimension_numbers = #tpu.dot_dimension_numbers<[1], [0], [0], [1], [0, 0, 1, 1], [], []>} : vector<8x8xbf16>, vector<8x4xbf16>, vector<8x4xf32> -> vector<8x4xf32>
    %60 = vector.extract_strided_slice %12 {offsets = [0, 8], sizes = [8, 4], strides = [1, 1]} : vector<8x32xf32> to vector<8x4xf32>
    %61 = arith.truncf %60 : vector<8x4xf32> to vector<8x4xbf16>
    %62 = vector.extract_strided_slice %20 {offsets = [0, 8], sizes = [8, 4], strides = [1, 1]} : vector<8x32xf32> to vector<8x4xf32>
    %63 = arith.truncf %62 : vector<8x4xf32> to vector<8x4xbf16>
    %64 = vector.extract_strided_slice %21 {offsets = [0, 8], sizes = [8, 4], strides = [1, 1]} : vector<8x32xf32> to vector<8x4xf32>
    %65 = arith.truncf %64 : vector<8x4xf32> to vector<8x4xbf16>
    "tpu.trace_start"() <{level = 10 : i32, message = "qd,kd->qk"}> : () -> ()
    %cst_23 = arith.constant dense<0.000000e+00> : vector<8x8xf32>
    %66 = tpu.matmul %61, %63, %cst_23 {dimension_numbers = #tpu.dot_dimension_numbers<[1], [1], [0], [0], [0, 0, 1, 0], [], []>} : vector<8x4xbf16>, vector<8x4xbf16>, vector<8x8xf32> -> vector<8x8xf32>
    "tpu.trace_stop"() : () -> ()
    %cst_24 = arith.constant dense<0xFF800000> : vector<8xf32>
    %67 = vector.multi_reduction <maximumf>, %66, %cst_24 [1] : vector<8x8xf32> to vector<8xf32>
    %68 = vector.shape_cast %67 : vector<8xf32> to vector<8x1xf32>
    %69 = vector.broadcast %68 : vector<8x1xf32> to vector<8x8xf32>
    %70 = arith.subf %66, %69 : vector<8x8xf32>
    %71 = math.exp %70 : vector<8x8xf32>
    %cst_25 = arith.constant dense<0.000000e+00> : vector<8xf32>
    %72 = vector.multi_reduction <add>, %71, %cst_25 [1] : vector<8x8xf32> to vector<8xf32>
    %73 = vector.shape_cast %72 : vector<8xf32> to vector<8x1xf32>
    %74 = tpu.reciprocal %73 {approx = true} : vector<8x1xf32> -> vector<8x1xf32>
    %75 = vector.broadcast %74 : vector<8x1xf32> to vector<8x8xf32>
    %76 = arith.mulf %71, %75 : vector<8x8xf32>
    %77 = arith.truncf %76 : vector<8x8xf32> to vector<8x8xbf16>
    %cst_26 = arith.constant dense<0.000000e+00> : vector<8x4xf32>
    %78 = tpu.matmul %77, %65, %cst_26 {dimension_numbers = #tpu.dot_dimension_numbers<[1], [0], [0], [1], [0, 0, 1, 1], [], []>} : vector<8x8xbf16>, vector<8x4xbf16>, vector<8x4xf32> -> vector<8x4xf32>
    %79 = vector.extract_strided_slice %12 {offsets = [0, 12], sizes = [8, 4], strides = [1, 1]} : vector<8x32xf32> to vector<8x4xf32>
    %80 = arith.truncf %79 : vector<8x4xf32> to vector<8x4xbf16>
    %81 = vector.extract_strided_slice %20 {offsets = [0, 12], sizes = [8, 4], strides = [1, 1]} : vector<8x32xf32> to vector<8x4xf32>
    %82 = arith.truncf %81 : vector<8x4xf32> to vector<8x4xbf16>
    %83 = vector.extract_strided_slice %21 {offsets = [0, 12], sizes = [8, 4], strides = [1, 1]} : vector<8x32xf32> to vector<8x4xf32>
    %84 = arith.truncf %83 : vector<8x4xf32> to vector<8x4xbf16>
    "tpu.trace_start"() <{level = 10 : i32, message = "qd,kd->qk"}> : () -> ()
    %cst_27 = arith.constant dense<0.000000e+00> : vector<8x8xf32>
    %85 = tpu.matmul %80, %82, %cst_27 {dimension_numbers = #tpu.dot_dimension_numbers<[1], [1], [0], [0], [0, 0, 1, 0], [], []>} : vector<8x4xbf16>, vector<8x4xbf16>, vector<8x8xf32> -> vector<8x8xf32>
    "tpu.trace_stop"() : () -> ()
    %cst_28 = arith.constant dense<0xFF800000> : vector<8xf32>
    %86 = vector.multi_reduction <maximumf>, %85, %cst_28 [1] : vector<8x8xf32> to vector<8xf32>
    %87 = vector.shape_cast %86 : vector<8xf32> to vector<8x1xf32>
    %88 = vector.broadcast %87 : vector<8x1xf32> to vector<8x8xf32>
    %89 = arith.subf %85, %88 : vector<8x8xf32>
    %90 = math.exp %89 : vector<8x8xf32>
    %cst_29 = arith.constant dense<0.000000e+00> : vector<8xf32>
    %91 = vector.multi_reduction <add>, %90, %cst_29 [1] : vector<8x8xf32> to vector<8xf32>
    %92 = vector.shape_cast %91 : vector<8xf32> to vector<8x1xf32>
    %93 = tpu.reciprocal %92 {approx = true} : vector<8x1xf32> -> vector<8x1xf32>
    %94 = vector.broadcast %93 : vector<8x1xf32> to vector<8x8xf32>
    %95 = arith.mulf %90, %94 : vector<8x8xf32>
    %96 = arith.truncf %95 : vector<8x8xf32> to vector<8x8xbf16>
    %cst_30 = arith.constant dense<0.000000e+00> : vector<8x4xf32>
    %97 = tpu.matmul %96, %84, %cst_30 {dimension_numbers = #tpu.dot_dimension_numbers<[1], [0], [0], [1], [0, 0, 1, 1], [], []>} : vector<8x8xbf16>, vector<8x4xbf16>, vector<8x4xf32> -> vector<8x4xf32>
    %98 = vector.extract_strided_slice %12 {offsets = [0, 16], sizes = [8, 4], strides = [1, 1]} : vector<8x32xf32> to vector<8x4xf32>
    %99 = arith.truncf %98 : vector<8x4xf32> to vector<8x4xbf16>
    %100 = vector.extract_strided_slice %20 {offsets = [0, 16], sizes = [8, 4], strides = [1, 1]} : vector<8x32xf32> to vector<8x4xf32>
    %101 = arith.truncf %100 : vector<8x4xf32> to vector<8x4xbf16>
    %102 = vector.extract_strided_slice %21 {offsets = [0, 16], sizes = [8, 4], strides = [1, 1]} : vector<8x32xf32> to vector<8x4xf32>
    %103 = arith.truncf %102 : vector<8x4xf32> to vector<8x4xbf16>
    "tpu.trace_start"() <{level = 10 : i32, message = "qd,kd->qk"}> : () -> ()
    %cst_31 = arith.constant dense<0.000000e+00> : vector<8x8xf32>
    %104 = tpu.matmul %99, %101, %cst_31 {dimension_numbers = #tpu.dot_dimension_numbers<[1], [1], [0], [0], [0, 0, 1, 0], [], []>} : vector<8x4xbf16>, vector<8x4xbf16>, vector<8x8xf32> -> vector<8x8xf32>
    "tpu.trace_stop"() : () -> ()
    %cst_32 = arith.constant dense<0xFF800000> : vector<8xf32>
    %105 = vector.multi_reduction <maximumf>, %104, %cst_32 [1] : vector<8x8xf32> to vector<8xf32>
    %106 = vector.shape_cast %105 : vector<8xf32> to vector<8x1xf32>
    %107 = vector.broadcast %106 : vector<8x1xf32> to vector<8x8xf32>
    %108 = arith.subf %104, %107 : vector<8x8xf32>
    %109 = math.exp %108 : vector<8x8xf32>
    %cst_33 = arith.constant dense<0.000000e+00> : vector<8xf32>
    %110 = vector.multi_reduction <add>, %109, %cst_33 [1] : vector<8x8xf32> to vector<8xf32>
    %111 = vector.shape_cast %110 : vector<8xf32> to vector<8x1xf32>
    %112 = tpu.reciprocal %111 {approx = true} : vector<8x1xf32> -> vector<8x1xf32>
    %113 = vector.broadcast %112 : vector<8x1xf32> to vector<8x8xf32>
    %114 = arith.mulf %109, %113 : vector<8x8xf32>
    %115 = arith.truncf %114 : vector<8x8xf32> to vector<8x8xbf16>
    %cst_34 = arith.constant dense<0.000000e+00> : vector<8x4xf32>
    %116 = tpu.matmul %115, %103, %cst_34 {dimension_numbers = #tpu.dot_dimension_numbers<[1], [0], [0], [1], [0, 0, 1, 1], [], []>} : vector<8x8xbf16>, vector<8x4xbf16>, vector<8x4xf32> -> vector<8x4xf32>
    %117 = vector.extract_strided_slice %12 {offsets = [0, 20], sizes = [8, 4], strides = [1, 1]} : vector<8x32xf32> to vector<8x4xf32>
    %118 = arith.truncf %117 : vector<8x4xf32> to vector<8x4xbf16>
    %119 = vector.extract_strided_slice %20 {offsets = [0, 20], sizes = [8, 4], strides = [1, 1]} : vector<8x32xf32> to vector<8x4xf32>
    %120 = arith.truncf %119 : vector<8x4xf32> to vector<8x4xbf16>
    %121 = vector.extract_strided_slice %21 {offsets = [0, 20], sizes = [8, 4], strides = [1, 1]} : vector<8x32xf32> to vector<8x4xf32>
    %122 = arith.truncf %121 : vector<8x4xf32> to vector<8x4xbf16>
    "tpu.trace_start"() <{level = 10 : i32, message = "qd,kd->qk"}> : () -> ()
    %cst_35 = arith.constant dense<0.000000e+00> : vector<8x8xf32>
    %123 = tpu.matmul %118, %120, %cst_35 {dimension_numbers = #tpu.dot_dimension_numbers<[1], [1], [0], [0], [0, 0, 1, 0], [], []>} : vector<8x4xbf16>, vector<8x4xbf16>, vector<8x8xf32> -> vector<8x8xf32>
    "tpu.trace_stop"() : () -> ()
    %cst_36 = arith.constant dense<0xFF800000> : vector<8xf32>
    %124 = vector.multi_reduction <maximumf>, %123, %cst_36 [1] : vector<8x8xf32> to vector<8xf32>
    %125 = vector.shape_cast %124 : vector<8xf32> to vector<8x1xf32>
    %126 = vector.broadcast %125 : vector<8x1xf32> to vector<8x8xf32>
    %127 = arith.subf %123, %126 : vector<8x8xf32>
    %128 = math.exp %127 : vector<8x8xf32>
    %cst_37 = arith.constant dense<0.000000e+00> : vector<8xf32>
    %129 = vector.multi_reduction <add>, %128, %cst_37 [1] : vector<8x8xf32> to vector<8xf32>
    %130 = vector.shape_cast %129 : vector<8xf32> to vector<8x1xf32>
    %131 = tpu.reciprocal %130 {approx = true} : vector<8x1xf32> -> vector<8x1xf32>
    %132 = vector.broadcast %131 : vector<8x1xf32> to vector<8x8xf32>
    %133 = arith.mulf %128, %132 : vector<8x8xf32>
    %134 = arith.truncf %133 : vector<8x8xf32> to vector<8x8xbf16>
    %cst_38 = arith.constant dense<0.000000e+00> : vector<8x4xf32>
    %135 = tpu.matmul %134, %122, %cst_38 {dimension_numbers = #tpu.dot_dimension_numbers<[1], [0], [0], [1], [0, 0, 1, 1], [], []>} : vector<8x8xbf16>, vector<8x4xbf16>, vector<8x4xf32> -> vector<8x4xf32>
    %136 = vector.extract_strided_slice %12 {offsets = [0, 24], sizes = [8, 4], strides = [1, 1]} : vector<8x32xf32> to vector<8x4xf32>
    %137 = arith.truncf %136 : vector<8x4xf32> to vector<8x4xbf16>
    %138 = vector.extract_strided_slice %20 {offsets = [0, 24], sizes = [8, 4], strides = [1, 1]} : vector<8x32xf32> to vector<8x4xf32>
    %139 = arith.truncf %138 : vector<8x4xf32> to vector<8x4xbf16>
    %140 = vector.extract_strided_slice %21 {offsets = [0, 24], sizes = [8, 4], strides = [1, 1]} : vector<8x32xf32> to vector<8x4xf32>
    %141 = arith.truncf %140 : vector<8x4xf32> to vector<8x4xbf16>
    "tpu.trace_start"() <{level = 10 : i32, message = "qd,kd->qk"}> : () -> ()
    %cst_39 = arith.constant dense<0.000000e+00> : vector<8x8xf32>
    %142 = tpu.matmul %137, %139, %cst_39 {dimension_numbers = #tpu.dot_dimension_numbers<[1], [1], [0], [0], [0, 0, 1, 0], [], []>} : vector<8x4xbf16>, vector<8x4xbf16>, vector<8x8xf32> -> vector<8x8xf32>
    "tpu.trace_stop"() : () -> ()
    %cst_40 = arith.constant dense<0xFF800000> : vector<8xf32>
    %143 = vector.multi_reduction <maximumf>, %142, %cst_40 [1] : vector<8x8xf32> to vector<8xf32>
    %144 = vector.shape_cast %143 : vector<8xf32> to vector<8x1xf32>
    %145 = vector.broadcast %144 : vector<8x1xf32> to vector<8x8xf32>
    %146 = arith.subf %142, %145 : vector<8x8xf32>
    %147 = math.exp %146 : vector<8x8xf32>
    %cst_41 = arith.constant dense<0.000000e+00> : vector<8xf32>
    %148 = vector.multi_reduction <add>, %147, %cst_41 [1] : vector<8x8xf32> to vector<8xf32>
    %149 = vector.shape_cast %148 : vector<8xf32> to vector<8x1xf32>
    %150 = tpu.reciprocal %149 {approx = true} : vector<8x1xf32> -> vector<8x1xf32>
    %151 = vector.broadcast %150 : vector<8x1xf32> to vector<8x8xf32>
    %152 = arith.mulf %147, %151 : vector<8x8xf32>
    %153 = arith.truncf %152 : vector<8x8xf32> to vector<8x8xbf16>
    %cst_42 = arith.constant dense<0.000000e+00> : vector<8x4xf32>
    %154 = tpu.matmul %153, %141, %cst_42 {dimension_numbers = #tpu.dot_dimension_numbers<[1], [0], [0], [1], [0, 0, 1, 1], [], []>} : vector<8x8xbf16>, vector<8x4xbf16>, vector<8x4xf32> -> vector<8x4xf32>
    %155 = vector.extract_strided_slice %12 {offsets = [0, 28], sizes = [8, 4], strides = [1, 1]} : vector<8x32xf32> to vector<8x4xf32>
    %156 = arith.truncf %155 : vector<8x4xf32> to vector<8x4xbf16>
    %157 = vector.extract_strided_slice %20 {offsets = [0, 28], sizes = [8, 4], strides = [1, 1]} : vector<8x32xf32> to vector<8x4xf32>
    %158 = arith.truncf %157 : vector<8x4xf32> to vector<8x4xbf16>
    %159 = vector.extract_strided_slice %21 {offsets = [0, 28], sizes = [8, 4], strides = [1, 1]} : vector<8x32xf32> to vector<8x4xf32>
    %160 = arith.truncf %159 : vector<8x4xf32> to vector<8x4xbf16>
    "tpu.trace_start"() <{level = 10 : i32, message = "qd,kd->qk"}> : () -> ()
    %cst_43 = arith.constant dense<0.000000e+00> : vector<8x8xf32>
    %161 = tpu.matmul %156, %158, %cst_43 {dimension_numbers = #tpu.dot_dimension_numbers<[1], [1], [0], [0], [0, 0, 1, 0], [], []>} : vector<8x4xbf16>, vector<8x4xbf16>, vector<8x8xf32> -> vector<8x8xf32>
    "tpu.trace_stop"() : () -> ()
    %cst_44 = arith.constant dense<0xFF800000> : vector<8xf32>
    %162 = vector.multi_reduction <maximumf>, %161, %cst_44 [1] : vector<8x8xf32> to vector<8xf32>
    %163 = vector.shape_cast %162 : vector<8xf32> to vector<8x1xf32>
    %164 = vector.broadcast %163 : vector<8x1xf32> to vector<8x8xf32>
    %165 = arith.subf %161, %164 : vector<8x8xf32>
    %166 = math.exp %165 : vector<8x8xf32>
    %cst_45 = arith.constant dense<0.000000e+00> : vector<8xf32>
    %167 = vector.multi_reduction <add>, %166, %cst_45 [1] : vector<8x8xf32> to vector<8xf32>
    %168 = vector.shape_cast %167 : vector<8xf32> to vector<8x1xf32>
    %169 = tpu.reciprocal %168 {approx = true} : vector<8x1xf32> -> vector<8x1xf32>
    %170 = vector.broadcast %169 : vector<8x1xf32> to vector<8x8xf32>
    %171 = arith.mulf %166, %170 : vector<8x8xf32>
    %172 = arith.truncf %171 : vector<8x8xf32> to vector<8x8xbf16>
    %cst_46 = arith.constant dense<0.000000e+00> : vector<8x4xf32>
    %173 = tpu.matmul %172, %160, %cst_46 {dimension_numbers = #tpu.dot_dimension_numbers<[1], [0], [0], [1], [0, 0, 1, 1], [], []>} : vector<8x8xbf16>, vector<8x4xbf16>, vector<8x4xf32> -> vector<8x4xf32>
    %174 = tpu.concatenate %40, %59, %78, %97, %116, %135, %154, %173 in 1 : vector<8x4xf32>, vector<8x4xf32>, vector<8x4xf32>, vector<8x4xf32>, vector<8x4xf32>, vector<8x4xf32>, vector<8x4xf32>, vector<8x4xf32> -> vector<8x32xf32>
    %175 = arith.truncf %174 : vector<8x32xf32> to vector<8x32xbf16>
    %c0_47 = arith.constant 0 : index
    %c0_48 = arith.constant 0 : index
    %176 = vector.load %arg8[%c0_47, %c0_48] : memref<32x32xbf16, #tpu.memory_space<vmem>>, vector<32x32xbf16>
    %cst_49 = arith.constant dense<0.000000e+00> : vector<8x32xf32>
    %177 = tpu.matmul %175, %176, %cst_49 {dimension_numbers = #tpu.dot_dimension_numbers<[1], [0], [0], [1], [0, 0, 1, 1], [], []>} : vector<8x32xbf16>, vector<32x32xbf16>, vector<8x32xf32> -> vector<8x32xf32>
    %c0_50 = arith.constant 0 : index
    %c0_51 = arith.constant 0 : index
    %178 = vector.load %arg9[%c0_50, %c0_51] : memref<1x32xf32, #tpu.memory_space<vmem>>, vector<1x32xf32>
    %179 = vector.shape_cast %178 : vector<1x32xf32> to vector<32xf32>
    %180 = vector.shape_cast %179 : vector<32xf32> to vector<1x32xf32>
    %181 = vector.broadcast %180 : vector<1x32xf32> to vector<8x32xf32>
    %182 = arith.addf %177, %181 : vector<8x32xf32>
    %c0_52 = arith.constant 0 : index
    %c0_53 = arith.constant 0 : index
    %c0_54 = arith.constant 0 : index
    %183 = vector.load %arg10[%c0_52, %c0_53, %c0_54] : memref<1x8x32xf32, #tpu.memory_space<vmem>>, vector<1x8x32xf32>
    %184 = vector.shape_cast %183 : vector<1x8x32xf32> to vector<8x32xf32>
    %185 = vector.shape_cast %182 : vector<8x32xf32> to vector<1x8x32xf32>
    tpu.vector_store %arg10[%c0_52, %c0_53, %c0_54], %185 {strides = array<i32>} : memref<1x8x32xf32, #tpu.memory_space<vmem>>, vector<1x8x32xf32>,
    return
  }
  func.func @transform_0(%arg0: i32, %arg1: i32) -> (i32, i32, i32) {
    %c0_i32 = arith.constant 0 : i32
    %c0_i32_0 = arith.constant 0 : i32
    return %arg0, %arg1, %c0_i32 : i32, i32, i32
  }
  func.func @transform_1(%arg0: i32, %arg1: i32) -> (i32, i32, i32) {
    %c0_i32 = arith.constant 0 : i32
    %c0_i32_0 = arith.constant 0 : i32
    %c0_i32_1 = arith.constant 0 : i32
    return %arg0, %c0_i32, %c0_i32_0 : i32, i32, i32
  }
  func.func @transform_2(%arg0: i32, %arg1: i32) -> (i32, i32) {
    %c0_i32 = arith.constant 0 : i32
    %c0_i32_0 = arith.constant 0 : i32
    %c0_i32_1 = arith.constant 0 : i32
    return %c0_i32, %c0_i32_0 : i32, i32
  }
  func.func @transform_3(%arg0: i32, %arg1: i32) -> (i32, i32) {
    %c0_i32 = arith.constant 0 : i32
    %c0_i32_0 = arith.constant 0 : i32
    %c0_i32_1 = arith.constant 0 : i32
    return %c0_i32, %c0_i32_0 : i32, i32
  }
  func.func @transform_4(%arg0: i32, %arg1: i32) -> (i32, i32) {
    %c0_i32 = arith.constant 0 : i32
    %c0_i32_0 = arith.constant 0 : i32
    %c0_i32_1 = arith.constant 0 : i32
    return %c0_i32, %c0_i32_0 : i32, i32
  }
  func.func @transform_5(%arg0: i32, %arg1: i32) -> (i32, i32) {
    %c0_i32 = arith.constant 0 : i32
    %c0_i32_0 = arith.constant 0 : i32
    %c0_i32_1 = arith.constant 0 : i32
    return %c0_i32, %c0_i32_0 : i32, i32
  }
  func.func @transform_6(%arg0: i32, %arg1: i32) -> (i32, i32) {
    %c0_i32 = arith.constant 0 : i32
    %c0_i32_0 = arith.constant 0 : i32
    %c0_i32_1 = arith.constant 0 : i32
    return %c0_i32, %c0_i32_0 : i32, i32
  }
  func.func @transform_7(%arg0: i32, %arg1: i32) -> (i32, i32) {
    %c0_i32 = arith.constant 0 : i32
    %c0_i32_0 = arith.constant 0 : i32
    %c0_i32_1 = arith.constant 0 : i32
    return %c0_i32, %c0_i32_0 : i32, i32
  }
  func.func @transform_8(%arg0: i32, %arg1: i32) -> (i32, i32, i32) {
    %c0_i32 = arith.constant 0 : i32
    %c0_i32_0 = arith.constant 0 : i32
    return %arg0, %arg1, %c0_i32 : i32, i32, i32
  }
}

</mosaic_0001>

<bundles_post_ra>
// kernel: tpu_custom_call.1
= control target key start
LH: loop header
LB: loop body
LE: loop exit
PB: predicated region body
PF: predicated region fallthrough
CT: control target
= control target key end

     0   :  { %s3443_s0 = inlined_call_operand.hbm [shape: bf16[2,8,32], index: 0, kind: input, shape index: {}]   ;;  %s3444_s1 = inlined_call_operand.hbm [shape: bf16[2,8,32], index: 1, kind: input, shape index: {}]   ;;  %s3445_s2 = inlined_call_operand.hbm [shape: bf16[32,32], index: 2, kind: input, shape index: {}]   ;;  %s3446_s3 = inlined_call_operand.vmem [shape: f32[1,32], index: 3, kind: input, shape index: {}]   ;;  %s3447_s4 = inlined_call_operand.hbm [shape: bf16[32,64], index: 4, kind: input, shape index: {}]   ;;  %s3448_s5 = inlined_call_operand.vmem [shape: f32[1,64], index: 5, kind: input, shape index: {}]   ;;  %s3449_s6 = inlined_call_operand.hbm [shape: bf16[32,32], index: 6, kind: input, shape index: {}]   ;;  %s3450_s7 = inlined_call_operand.vmem [shape: f32[1,32], index: 7, kind: input, shape index: {}]   ;;  %s3451_s8 = inlined_call_operand.hbm [shape: f32[2,8,32], index: 8, kind: output, shape index: {}]  }
   0x1   :  { %3457 = sst [smem:[#allocation23_spill]] %s3445_s2 }
   0x2   :  { %3458 = sst [smem:[#allocation24_spill]] %s3447_s4 }
   0x3   :  { %3459 = sst [smem:[#allocation25_spill]] %s3449_s6 }
   0x4   :  { %13 = vsyncpa [#allocation3], 0 }
   0x5   :  { %15 = vsyncpa [#allocation3 + $0x1], 0 }
   0x6   :  { %16 = vsyncpa [#allocation6], 0 }
   0x7   :  { %18 = vsyncpa [#allocation6 + $0x1], 0 }
   0x8   :  { %19 = vsyncpa [#allocation9], 0 }
   0x9   :  { %20 = vsyncpa [#allocation4], 0 }
   0xa   :  { %22 = vsyncpa [#allocation4 + $0x1], 0  ;;  %s2699_s27 = smov 0   ;;  %s2701_s28 = smov 0  }
   0xb   :  { %s2703_s29 = smov 0   ;;  %s2705_s30 = smov 0  }
   0xc   :  { %s2707_s9 = smov 0   ;;  %s2709_s10 = smov 0  }
   0xd LB: > { %3460 = sst [smem:[#allocation17_spill]] %s2610_s27  ;;  %s2730_s11 = sadd.s32 4294967295, %s2630_s10   ;;  %s2630_s10 = sphi %s2709_s10, %s28_s10   ;;  %s2626_s9 = sphi %s2707_s9, %s3480_s9   ;;  %s2622_s30 = sphi %s2705_s30, %s3479_s30   ;;  %s2618_s29 = sphi %s2703_s29, %s3483_s29   ;;  %s2614_s28 = sphi %s2701_s28, %s3482_s28   ;;  %s2610_s27 = sphi %s2699_s27, %s3481_s27  }
   0xe   : > { %3461 = sst [smem:[#allocation18_spill]] %s2618_s29  ;;  %p2125_p0 = scmp.ge.s32.totalorder %s2630_s10, 1 }
   0xf   : > { %3462 = sst [smem:[#allocation19_spill]] %s2626_s9  ;;  %p63_p1 = scmp.eq.s32.totalorder %s2730_s11, 0 }
  0x10   : > { %p253_p2 = scmp.lt.s32.totalorder %s2630_s10, 3  ;;  %s3463_s2 = sld [smem:[#allocation23_spill]] }
  0x11   : > { %s2632_s16 = smov [#allocation7]   ;;  %p2129_p6 = scmp.ge.s32.totalorder %s2630_s10, 2 }
  0x12   : > { %p2738_p3 = pnand %p2125_p0, %p253_p2  ;;  %s266_s17 = sshll.u32 %s2632_s16, 4  ;;  %s267_s17 = int_to_ptr.vmem [resolvable:$true] %s266_s17 }
  0x13   : > { %s3466_s4 = sld [smem:[#allocation24_spill]]  ;;  %s2633_s22 = smov 64  }
  0x14   : > { %p2212_p4 = pneg %p2738_p3  ;;  %s2634_s23 = smov 4  }
  0x15   : > { %s2635_s24 = smov [#allocation8]   ;;  %s3467_s6 = sld [smem:[#allocation25_spill]] }
  0x16   : > { %s264_s14 = sshll.u32 %s3463_s2, 4  ;;  %p2746_p5 = pnand %p2212_p4, %p63_p1  ;;  %s265_s14 = int_to_ptr.hbm [resolvable:$true] %s264_s14 }
  0x17   : > { %s283_s25 = sshll.u32 %s2635_s24, 4  ;;  %s2636_s16 = smov [#allocation10]   ;;  %s284_s25 = int_to_ptr.vmem [resolvable:$true] %s283_s25 }
  0x18   : > { %2215 = dma.hbm_to_vmem [thread:$0]  (!%p2746_p5), %s265_s14, 256, %s267_s17, [#allocation6], %s2633_s22, %s2633_s22, %s2634_s23  }
  0x19   : > { %s281_s21 = sshll.u32 %s3466_s4, 4  ;;  %s300_s19 = sshll.u32 %s2636_s16, 4  ;;  %s282_s21 = int_to_ptr.hbm [resolvable:$true] %s281_s21  ;;  %s301_s19 = int_to_ptr.vmem [resolvable:$true] %s300_s19 }
  0x1a   : > { %2218 = dma.hbm_to_vmem [thread:$0]  (!%p2746_p5), %s282_s21, 256, %s284_s25, [#allocation9], %s2633_s22, %s2633_s22, %s2634_s23  }
  0x1b   : > { %s298_s13 = sshll.u32 %s3467_s6, 4  ;;  %s2124_s14 = sadd.s32 4294967294, %s2630_s10   ;;  %s299_s13 = int_to_ptr.hbm [resolvable:$true] %s298_s13 }
  0x1c   : > { %2221 = dma.hbm_to_vmem [thread:$0]  (!%p2746_p5), %s299_s13, 256, %s301_s19, [#allocation9], %s2633_s22, %s2633_s22, %s2634_s23  }
  0x1d   : > { %s40_s17 = sadd.s32 1, %s2626_s9  ;;  %s49_s20 = sadd.s32 1, %s2618_s29 }
  0x1e   : > { %p42_p7 = scmp.ge.s32.totalorder %s40_s17, 2  ;;  %p56_p8 = scmp.ne.s32.totalorder %s2618_s29, %s2614_s28 }
  0x1f   : > { %p57_p9 = scmp.eq.s32.totalorder %s2630_s10, 0  ;;  %p62_p10 = scmp.ne.s32.totalorder %s2614_s28, %s2610_s27 }
  0x20   : > { %s3485_s17 = smov (%p42_p7, %s40_s17), 0  ;;  %p240_p13 = scmp.eq.s32.totalorder %s2730_s11, 1 }
  0x21   : > { %3468 = sst [smem:[#allocation20_spill]] %s3485_s17  ;;  %p2773_p11 = por %p57_p9, %p56_p8 }
  0x22   : > { %p2779_p12 = por %p63_p1, %p62_p10  ;;  %s44_s22 = ssub.s32 %s2626_s9, %s3485_s17 }
  0x23   : > { %p47_p0 = scmp.eq.s32.totalorder %s44_s22, 0  ;;  %p246_p2 = scmp.eq.s32.totalorder %s2124_s14, 1 }
  0x24   : > { %p2786_p4 = por %p240_p13, %p56_p8  ;;  %p2236_p5 = scmp.lt.s32.totalorder %s2630_s10, 2 }
  0x25   : > { %s2792_s24 = scalar_select %p47_p0, %s2618_s29, %s49_s20  }
  0x26   : > { %p2794_p7 = por %p246_p2, %p62_p10  ;;  %s317_s26 = sand.u32 1, %s2618_s29  }
  0x27   : > { %3472 = sst [smem:[#allocation21_spill]] %s2792_s24  ;;  %s2130_s12 = sshll.u32 %s317_s26, 2 }
  0x28   : > { %s3473_s25 = scalar_select %p2794_p7, 1, 0 }
  0x29   : > { %s2131_s13 = sshll.u32 %s2626_s9, 2  ;;  %s321_s14 = scalar_lea.vmem [#allocation2], %s2130_s12 }
  0x2a   : > { %3474 = sst [smem:[#allocation22_spill]] %s3473_s25  ;;  %s326_s22 = scalar_lea.hbm %s3443_s0, %s2131_s13 }
  0x2b   : > { %s330_s2 = sshll.u32 %s321_s14, 4  ;;  %s328_s4 = sshll.u32 %s326_s22, 4  ;;  %s331_s2 = int_to_ptr.vmem [resolvable:$true] %s330_s2  ;;  %s329_s4 = int_to_ptr.hbm [resolvable:$true] %s328_s4 }
  0x2c   : > { %p2223_p8 = pnand %p2236_p5, %p2773_p11  ;;  %s345_s17 = scalar_lea.hbm %s3444_s1, %s2131_s13 }
  0x2d   : > { %s337_s24 = sand.u32 1, %s2630_s10   ;;  %s318_s25 = scalar_lea.sflag [#allocation3], %s317_s26 }
  0x2e   : > { %2225 = dma.hbm_to_vmem [thread:$0]  (!%p2223_p8), %s329_s4, 64, %s331_s2, %s318_s25  }
  0x2f   : > { %s347_s29 = sshll.u32 %s345_s17, 4  ;;  %s341_s9 = scalar_lea.vmem [#allocation5], %s2130_s12  ;;  %s348_s29 = int_to_ptr.hbm [resolvable:$true] %s347_s29 }
  0x30   : > { %s349_s27 = sshll.u32 %s341_s9, 4  ;;  %s338_s16 = scalar_lea.sflag [#allocation6], %s337_s24  ;;  %s350_s27 = int_to_ptr.vmem [resolvable:$true] %s349_s27 }
  0x31   : > { %2228 = dma.hbm_to_vmem [thread:$0]  (!%p2223_p8), %s348_s29, 64, %s350_s27, %s338_s16  }
  0x32   : > { %358 = sbr.rel (%p2738_p3) target bundleno = 1229 (0x4cd), region = 52  ;;  %s2812_s21 = sand.u32 (!%p2738_p3), 1, %s2614_s28  }
  0x33   : > { %s2135_s6 = sshll.u32 (!%p2738_p3), %s2812_s21, 2  ;;  %s361_s13 = scalar_lea.sflag (!%p2738_p3), [#allocation3], %s2812_s21 }
  0x34   : > { %s364_s26 = scalar_lea.vmem (!%p2738_p3), [#allocation2], %s2135_s6 }
  0x37   : > { %2589 = dma.done.wait (%p2779_p12), %s361_s13, 64  }
  0x38   : > { %2591 = vsyncadd (%p2779_p12), %s361_s13, 4294967232  ;;  %s370_s2 = sand.u32 1, %s2730_s11   ;;  %s374_s27 = scalar_lea.vmem [#allocation5], %s2135_s6 }
  0x39   : > { %s371_s4 = scalar_lea.sflag [#allocation6], %s370_s2 }
  0x3a   : > { %2593 = dma.done.wait (%p2779_p12), %s371_s4, 64  }
  0x3b   : > { %2595 = vsyncadd (%p2779_p12), %s371_s4, 4294967232 }
  0x3c   : > { %2597 = dma.done.wait (%p63_p1), [#allocation6], 256  }
  0x3d   : > { %2599 = vsyncadd (%p63_p1), [#allocation6], 4294967040 }
  0x3e   : > { %2601 = dma.done.wait (%p63_p1), [#allocation9], 512  }
  0x3f   : > { %2603 = vsyncadd (%p63_p1), [#allocation9], 4294966784  ;;  %v2189_v0 = vld [vmem:[#allocation7 + $0x8] sm:$0xff]  ;;  %v2191_v1 = vld [vmem:[#allocation8 + $0x8] sm:$0xff]  ;;  %vm451_vm0 = vcmask 261120   ;;  %s2637_s17 = smov 108  }
  0x40   : > { %v2188_v2 = vld [vmem:[#allocation7] sm:$0xff]  ;;  %461 = vmatpush.bf16.msra.mxu0 %v2189_v0  ;;  %498 = vmatpush.bf16.msra.mxu1 %v2191_v1  ;;  %v2190_v3 = vld [vmem:[#allocation8] sm:$0xff]  ;;  %v430_v5 = vld [vmem:[%s374_s27] sm:$0xf]  ;;  %s2638_s18 = smov 112   ;;  %s2639_s24 = smov 124  }
  0x41   : > { %v429_v4 = vld [vmem:[%s364_s26] sm:$0xf]  ;;  %s2640_s25 = smov 104   ;;  %s2641_s12 = smov 116   ;;  %v2644_v22 = vmov 1983009808  }
  0x42   : > { %v2351_v6 = vld [vmem:[%s3446_s3] ss:$0 sm:$0xff]  ;;  %s2642_s19 = smov 120   ;;  %s2643_s22 = smov 100   ;;  %v533_v23 = vunpack.c.l.s4 %v2644_v22  ;;  %vm528_vm1 = vcmask 1047556   ;;  %vm1270_vm2 = vcmask 31744  }
  0x43   : > { %v2352_v7 = vld [vmem:[%s3448_s5] ss:$0 sm:$0xff]  ;;  %v2645_v28 = vmov 1934713408   ;;  %vm1423_vm3 = vcmask 64512   ;;  %s2646_s14 = smov 96  }
  0x44   : > { %462 = vmatpush.bf16.msra.mxu0 %v2188_v2  ;;  %499 = vmatpush.bf16.msra.mxu1 %v2190_v3  ;;  %v581_v29 = vunpack.c.l.s4 %v2645_v28  ;;  %v2862_v32 = vunpack.c.0.s8 %v533_v23  ;;  %vm1523_vm4 = vcmask 1043456   ;;  %s2647_s20 = smov 4   ;;  %s2648_s16 = smov 12   ;;  %vm1927_vm5 = vcmask 97280  }
  0x45   : > { %s2649_s6 = smov 8   ;;  %s2650_s13 = smov 16   ;;  %vm1929_vm6 = vcmask 130048   ;;  %vm1931_vm7 = vcmask 162816   ;;  %vm1933_vm8 = vcmask 195584   ;;  %vm1935_vm9 = vcmask 228352  }
  0x46   : > { %v2871_v41 = vunpack.c.0.s8 %v581_v29  ;;  %s2651_s26 = smov 28   ;;  %s2652_s2 = smov 20  }
  0x47   : > { %2149 = vmatmul.msk.bf16.vlgmr.msra.gmra.mxu0 %vm451_vm0, %v429_v4  ;;  %2158 = vmatmul.msk.bf16.vlgmr.msra.gmra.mxu1 %vm451_vm0, %v430_v5  ;;  %s2653_s4 = smov 24   ;;  %s2185_s27 = sshll.u32 %s2622_s30, 3 }
  0x48   : > { %s2140_s29 = sshll.u32 %s2812_s21, 3  ;;  %s1987_s15 = scalar_lea.hbm %s3451_s8, %s2185_s27 }
  0x49   : > { %s1976_s30 = scalar_lea.sflag [#allocation4], %s2812_s21 }
  0xc4   : > { %v464_v8 = vpop.f32.mrf.mxu0  ;;  %v501_v9 = vpop.f32.mrf.mxu1 }
  0xc5   : > { %v465_v10 = vadd.f32 %v2351_v6, %v464_v8  ;;  %v2841_v11 = vadd.f32 %v2352_v7, %v501_v9 }
  0xc7   : > { %v2843_v12 = vmul.f32 0.5, %v465_v10  ;;  %773 = vrot.lane.b32.xlu2 %v2841_v11, %s2637_s17  ;;  %v784_v37 = vrot.slane %v2841_v11, 4 }
  0xc9   : > { %v2321_v13 = vpack.i.bf16 %v2843_v12, %v2841_v11  ;;  %v530_v43 = vrot.slane %v2843_v12, 4 }
  0xcb   : > { %2322 = vrot.lane.b32.xlu1 %v2321_v13, %s2638_s18  ;;  %2312 = vrot.lane.b32.xlu0 %v2321_v13, %s2639_s24  ;;  %s427_s24 = scalar_lea.vmem [#allocation11], %s2140_s29 }
  0xcc   : > { %v466_v14 = vpop.f32.mrf.mxu0  ;;  %v503_v15 = vpop.f32.mrf.mxu1 }
  0xcf   : > { %776 = vrot.lane.b32.xlu2 %v2841_v11, %s2640_s25 }
  0xd3   : > { %2327 = vrot.lane.b32.xlu1 %v2321_v13, %s2641_s12  ;;  %2317 = vrot.lane.b32.xlu0 %v2321_v13, %s2642_s19  ;;  %s1991_s12 = sshll.u32 %s1987_s15, 4  ;;  %s1992_s12 = int_to_ptr.hbm [resolvable:$true] %s1991_s12 }
  0xd4   : > { %s2550_s19 = sshra.s32 %s1992_s12, 4  ;;  %s2551_s19 = int_to_ptr.hbm [resolvable:$true] %s2550_s19 }
  0xd5   : > { %p2557_p10 = scmp.lt.s32.totalorder %s2551_s19, %s3451_s8 }
  0xd7   : > { %521 = vrot.lane.b32.xlu2 %v2843_v12, %s2640_s25  ;;  %s1989_s25 = sshll.u32 %s427_s24, 4  ;;  %s1990_s25 = int_to_ptr.vmem [resolvable:$true] %s1989_s25 }
  0xdb   : > { %518 = vrot.lane.b32.xlu1 %v2843_v12, %s2637_s17  ;;  %779 = vrot.lane.b32.xlu0 %v2841_v11, %s2643_s22 }
  0xe3   : > { %524 = vrot.lane.b32.xlu0 %v2843_v12, %s2643_s22  ;;  %s2552_s22 = scalar_lea.hbm %s2551_s19, 8 }
  0xe4   : > { %p2553_p1 = scmp.ne.s32.totalorder %s2551_s19, %s2552_s22 }
  0xe6   : > { %p2554_p3 = pnand %p2553_p1, %p2786_p4 }
  0xe8   : > { %p2555_p9 = pneg %p2554_p3 }
 0x121   : > { %v2853_v16 = vpop.permute.xlu2 %773 }
 0x129   : > { %v2855_v17 = vpop.permute.xlu2 %776 }
 0x12a   : > { %v806_v30 = vrot.slane %v2855_v17, 4 }
 0x131   : > { %v522_v21 = vpop.permute.xlu2 %521 }
 0x132   : > { %v552_v31 = vrot.slane %v522_v21, 4 }
 0x13d   : > { %v2323_v18 = vpop.permute.xlu1 %2322  ;;  %v2313_v19 = vpop.permute.xlu0 %2312 }
 0x13e   : > { %v2325_v20 = vunpack.i.h.bf16 %v2323_v18  ;;  %v2857_v24 = vunpack.i.l.bf16 %v2323_v18  ;;  %v2315_v26 = vunpack.i.h.bf16 %v2313_v19  ;;  %v2859_v27 = vunpack.i.l.bf16 %v2313_v19 }
 0x140   : > { %v554_v25 = vrot.slane %v2325_v20, 4  ;;  %v808_v33 = vrot.slane %v2857_v24, 4  ;;  %v553_v34 = vsel %vm528_vm1, %v552_v31, %v2325_v20  ;;  %v807_v36 = vsel %vm528_vm1, %v806_v30, %v2857_v24 }
 0x141   : > { %v542_v38 = vrot.slane %v2315_v26, 4  ;;  %v796_v39 = vrot.slane %v2859_v27, 4  ;;  %v2879_v48 = vperm.slane %v553_v34, %v2862_v32  ;;  %v2887_v51 = vperm.slane %v807_v36, %v2862_v32 }
 0x142   : > { %v555_v35 = vsel %vm528_vm1, %v522_v21, %v554_v25  ;;  %v809_v50 = vsel %vm528_vm1, %v2855_v17, %v808_v33 }
 0x143   : > { %v2882_v49 = vperm.slane %v555_v35, %v2862_v32  ;;  %v2902_v0 = vperm.slane %v809_v50, %v2862_v32  ;;  %v602_v28 = vrot.slane %v2879_v48, 4  ;;  %v856_v33 = vrot.slane %v2887_v51, 4 }
 0x145   : > { %v2328_v40 = vpop.permute.xlu1 %2327  ;;  %v2318_v42 = vpop.permute.xlu0 %2317  ;;  %v614_v31 = vrot.slane %v2882_v49, 4  ;;  %v868_v35 = vrot.slane %v2902_v0, 4 }
 0x146   : > { %v2330_v44 = vunpack.i.h.bf16 %v2328_v40  ;;  %v2874_v45 = vunpack.i.l.bf16 %v2328_v40  ;;  %v2320_v46 = vunpack.i.h.bf16 %v2318_v42  ;;  %v2876_v47 = vunpack.i.l.bf16 %v2318_v42 }
 0x148   : > { %v540_v52 = vrot.slane %v2330_v44, 4  ;;  %v543_v53 = vsel %vm528_vm1, %v2330_v44, %v542_v38  ;;  %v794_v54 = vrot.slane %v2874_v45, 4  ;;  %v797_v55 = vsel %vm528_vm1, %v2874_v45, %v796_v39 }
 0x149   : > { %v551_v56 = vperm.slane %v543_v53, %v2862_v32  ;;  %v805_v57 = vperm.slane %v797_v55, %v2862_v32  ;;  %v527_v58 = vrot.slane %v2320_v46, 4  ;;  %v531_v59 = vsel %vm528_vm1, %v2320_v46, %v530_v43 }
 0x14a   : > { %v541_v60 = vsel %vm528_vm1, %v540_v52, %v2315_v26  ;;  %v795_v61 = vsel %vm528_vm1, %v794_v54, %v2859_v27  ;;  %v539_v62 = vperm.slane %v531_v59, %v2862_v32  ;;  %v782_v63 = vrot.slane %v2876_v47, 4 }
 0x14b   : > { %v547_v1 = vperm.slane %v541_v60, %v2862_v32  ;;  %v588_v2 = vrot.slane %v551_v56, 4  ;;  %v801_v3 = vperm.slane %v795_v61, %v2862_v32  ;;  %v529_v4 = vsel %vm528_vm1, %v527_v58, %v2843_v12 }
 0x14c   : > { %v590_v5 = vrot.slane %v539_v62, 4  ;;  %v783_v6 = vsel %vm528_vm1, %v782_v63, %v2841_v11  ;;  %v785_v7 = vsel %vm528_vm1, %v2876_v47, %v784_v37  ;;  %v535_v10 = vperm.slane %v529_v4, %v2862_v32 }
 0x14d   : > { %v576_v8 = vrot.slane %v547_v1, 4  ;;  %v830_v9 = vrot.slane %v801_v3, 4  ;;  %v589_v13 = vsel %vm528_vm1, %v588_v2, %v539_v62  ;;  %v2914_v14 = vpop.permute.xlu0 %779  ;;  %v842_v15 = vrot.slane %v805_v57, 4  ;;  %v519_v25 = vpop.permute.xlu1 %518 }
 0x14e   : > { %v591_v18 = vsel %vm528_vm1, %v551_v56, %v590_v5  ;;  %v789_v12 = vperm.slane %v783_v6, %v2862_v32  ;;  %v793_v19 = vperm.slane %v785_v7, %v2862_v32  ;;  %v578_v20 = vrot.slane %v535_v10, 4 }
 0x14f   : > { %v577_v21 = vsel %vm528_vm1, %v576_v8, %v535_v10  ;;  %v2921_v22 = vperm.slane %v589_v13, %v2871_v41  ;;  %v2924_v23 = vperm.slane %v591_v18, %v2871_v41  ;;  %v820_v26 = vrot.slane %v2853_v16, 4 }
 0x150   : > { %v831_v29 = vsel %vm528_vm1, %v830_v9, %v789_v12  ;;  %v832_v30 = vrot.slane %v789_v12, 4  ;;  %v2932_v34 = vperm.slane %v577_v21, %v2871_v41  ;;  %v579_v36 = vsel %vm528_vm1, %v547_v1, %v578_v20 }
 0x151   : > { %v843_v37 = vsel %vm528_vm1, %v842_v15, %v793_v19  ;;  %v844_v38 = vrot.slane %v793_v19, 4  ;;  %v566_v39 = vrot.slane %v519_v25, 4  ;;  %v634_v40 = vrot.slane %v2921_v22, 4 }
 0x152   : > { %v638_v42 = vrot.slane %v2924_v23, 4  ;;  %v2940_v43 = vperm.slane %v831_v29, %v2871_v41  ;;  %v818_v44 = vrot.slane %v2914_v14, 4  ;;  %v833_v46 = vsel %vm528_vm1, %v801_v3, %v832_v30 }
 0x153   : > { %v845_v50 = vsel %vm528_vm1, %v805_v57, %v844_v38  ;;  %v821_v52 = vsel %vm528_vm1, %v2914_v14, %v820_v26  ;;  %v2346_v53 = vpack.i.bf16 %v2914_v14, %v2855_v17  ;;  %v2950_v54 = vperm.slane %v579_v36, %v2871_v41 }
 0x154   : > { %v626_v55 = vrot.slane %v2932_v34, 4  ;;  %v2954_v56 = vperm.slane %v843_v37, %v2871_v41  ;;  %v819_v58 = vsel %vm528_vm1, %v818_v44, %v2853_v16  ;;  %v829_v60 = vperm.slane %v821_v52, %v2862_v32 }
 0x155   : > { %v525_v59 = vpop.permute.xlu0 %524  ;;  %v825_v57 = vperm.slane %v819_v58, %v2862_v32  ;;  %v841_v63 = vperm.slane %v833_v46, %v2871_v41  ;;  %v853_v1 = vperm.slane %v845_v50, %v2871_v41  ;;  %v2336_v3 = vpack.i.bf16 %v2857_v24, %v2876_v47 }
 0x156   : > { %v564_v61 = vrot.slane %v525_v59, 4  ;;  %v567_v62 = vsel %vm528_vm1, %v525_v59, %v566_v39  ;;  %v866_v6 = vrot.slane %v829_v60, 4  ;;  %v869_v7 = vsel %vm528_vm1, %v829_v60, %v868_v35 }
 0x157   : > { %v575_v2 = vperm.slane %v567_v62, %v2862_v32  ;;  %v854_v4 = vrot.slane %v825_v57, 4  ;;  %v857_v5 = vsel %vm528_vm1, %v825_v57, %v856_v33  ;;  %v880_v8 = vrot.slane %v2940_v43, 4 }
 0x158   : > { %v865_v9 = vperm.slane %v857_v5, %v2871_v41  ;;  %v877_v10 = vperm.slane %v869_v7, %v2871_v41  ;;  %v565_v13 = vsel %vm528_vm1, %v564_v61, %v519_v25  ;;  %v888_v15 = vrot.slane %v2954_v56, 4 }
 0x159   : > { %v855_v18 = vsel %vm528_vm1, %v854_v4, %v2887_v51  ;;  %v867_v12 = vsel %vm528_vm1, %v866_v6, %v2902_v0  ;;  %v571_v19 = vperm.slane %v565_v13, %v2862_v32  ;;  %v892_v20 = vrot.slane %v853_v1, 4 }
 0x15a   : > { %v873_v21 = vperm.slane %v867_v12, %v2871_v41  ;;  %v890_v26 = vrot.slane %v877_v10, 4  ;;  %v612_v29 = vrot.slane %v575_v2, 4  ;;  %v861_v30 = vperm.slane %v855_v18, %v2871_v41 }
 0x15b   : > { %v600_v33 = vrot.slane %v571_v19, 4  ;;  %v603_v25 = vsel %vm528_vm1, %v571_v19, %v602_v28  ;;  %v615_v35 = vsel %vm528_vm1, %v575_v2, %v614_v31  ;;  %v630_v36 = vrot.slane %v2950_v54, 4 }
 0x15c   : > { %v884_v51 = vrot.slane %v841_v63, 4  ;;  %v882_v37 = vrot.slane %v865_v9, 4  ;;  %v889_v0 = vsel %vm528_vm1, %v873_v21, %v888_v15  ;;  %v2985_v38 = vsel %vm528_vm1, %v890_v26, %v853_v1 }
 0x15d   : > { %v893_v39 = vsel %vm528_vm1, %v877_v10, %v892_v20  ;;  %v932_v44 = vrot.slane %v889_v0, 4  ;;  %v601_v46 = vsel %vm528_vm1, %v600_v33, %v2879_v48  ;;  %v611_v28 = vperm.slane %v603_v25, %v2871_v41 }
 0x15e   : > { %v2991_v50 = vperm.slane %v601_v46, %v2871_v41  ;;  %v613_v31 = vsel %vm528_vm1, %v612_v29, %v2882_v49  ;;  %v623_v52 = vperm.slane %v615_v35, %v2871_v41  ;;  %v878_v58 = vrot.slane %v861_v30, 4 }
 0x15f   : > { %v886_v59 = vrot.slane %v873_v21, 4  ;;  %v885_v57 = vsel %vm528_vm1, %v865_v9, %v884_v51  ;;  %v619_v60 = vperm.slane %v613_v31, %v2871_v41  ;;  %v918_v61 = vrot.slane %v2985_v38, 4 }
 0x160   : > { %v930_v62 = vrot.slane %v893_v39, 4  ;;  %v3002_v48 = vsel %vm528_vm1, %v2991_v50, %v626_v55  ;;  %v628_v1 = vrot.slane %v611_v28, 4  ;;  %v636_v4 = vrot.slane %v623_v52, 4 }
 0x161   : > { %v632_v2 = vrot.slane %v619_v60, 4  ;;  %v635_v49 = vsel %vm528_vm1, %v619_v60, %v634_v40  ;;  %v639_v5 = vsel %vm528_vm1, %v623_v52, %v638_v42  ;;  %v933_v6 = vsel %vm528_vm1, %v893_v39, %v932_v44 }
 0x162   : > { %v3012_v7 = vsel %vm528_vm1, %v611_v28, %v630_v36  ;;  %v654_v9 = vrot.slane %v3002_v48, 4  ;;  %v676_v55 = vrot.slane %v639_v5, 4  ;;  %v3017_v10 = vsel %vm528_vm1, %v636_v4, %v2924_v23 }
 0x163   : > { %v879_v40 = vsel %vm528_vm1, %v878_v58, %v2940_v43  ;;  %v881_v13 = vsel %vm528_vm1, %v861_v30, %v880_v8  ;;  %v883_v15 = vsel %vm528_vm1, %v882_v37, %v841_v63  ;;  %v624_v42 = vrot.slane %v2991_v50, 4 }
 0x164   : > { %v3026_v18 = vsel %vm528_vm1, %v628_v1, %v2950_v54  ;;  %v3030_v12 = vsel %vm528_vm1, %v632_v2, %v2921_v22  ;;  %v678_v19 = vrot.slane %v635_v49, 4  ;;  %v652_v23 = vrot.slane %v3012_v7, 4 }
 0x165   : > { %v3035_v43 = vsel %vm528_vm1, %v3012_v7, %v654_v9  ;;  %v887_v63 = vsel %vm528_vm1, %v886_v59, %v2954_v56  ;;  %v894_v8 = vrot.slane %v883_v15, 4  ;;  %v664_v20 = vrot.slane %v3017_v10, 4 }
 0x166   : > { %v677_v54 = vsel %vm528_vm1, %v676_v55, %v635_v49  ;;  %v896_v21 = vrot.slane %v879_v40, 4  ;;  %v906_v26 = vrot.slane %v885_v57, 4  ;;  %v666_v22 = vrot.slane %v3030_v12, 4 }
 0x167   : > { %v895_v29 = vsel %vm528_vm1, %v894_v8, %v879_v40  ;;  %v908_v30 = vrot.slane %v881_v13, 4  ;;  %v919_v33 = vsel %vm528_vm1, %v918_v61, %v887_v63  ;;  %v3045_v25 = vsel %vm528_vm1, %v639_v5, %v678_v19 }
 0x168   : > { %v901_v35 = vperm.slane %v895_v29, %v2862_v32  ;;  %v907_v56 = vsel %vm528_vm1, %v906_v26, %v881_v13  ;;  %v920_v36 = vrot.slane %v887_v63, 4  ;;  %v3050_v51 = vperm.slane %v677_v54, %v2862_v32 }
 0x169   : > { %v913_v37 = vperm.slane %v907_v56, %v2862_v32  ;;  %v925_v39 = vperm.slane %v919_v33, %v2862_v32  ;;  %v931_v44 = vsel %vm528_vm1, %v930_v62, %v889_v0  ;;  %v897_v31 = vsel %vm528_vm1, %v883_v15, %v896_v21 }
 0x16a   : > { %v937_v46 = vperm.slane %v931_v44, %v2862_v32  ;;  %v944_v28 = vrot.slane %v901_v35, 4  ;;  %v909_v52 = vsel %vm528_vm1, %v885_v57, %v908_v30  ;;  %v905_v60 = vperm.slane %v897_v31, %v2862_v32 }
 0x16b   : > { %v942_v58 = vrot.slane %v913_v37, 4  ;;  %v968_v59 = vrot.slane %v925_v39, 4  ;;  %v917_v61 = vperm.slane %v909_v52, %v2862_v32  ;;  %v921_v0 = vsel %vm528_vm1, %v2985_v38, %v920_v36 }
 0x16c   : > { %v966_v1 = vrot.slane %v937_v46, 4  ;;  %v945_v2 = vsel %vm528_vm1, %v913_v37, %v944_v28  ;;  %v941_v62 = vperm.slane %v933_v6, %v2862_v32  ;;  %v929_v5 = vperm.slane %v921_v0, %v2862_v32 }
 0x16d   : > { %v943_v49 = vsel %vm528_vm1, %v942_v58, %v901_v35  ;;  %v953_v4 = vperm.slane %v945_v2, %v2871_v41  ;;  %v969_v57 = vsel %vm528_vm1, %v937_v46, %v968_v59  ;;  %v954_v13 = vrot.slane %v917_v61, 4 }
 0x16e   : > { %v949_v9 = vperm.slane %v943_v49, %v2871_v41  ;;  %v967_v55 = vsel %vm528_vm1, %v966_v1, %v925_v39  ;;  %v977_v40 = vperm.slane %v969_v57, %v2871_v41  ;;  %v956_v38 = vrot.slane %v905_v60, 4 }
 0x16f   : > { %v973_v15 = vperm.slane %v967_v55, %v2871_v41  ;;  %v978_v19 = vrot.slane %v941_v62, 4  ;;  %v980_v6 = vrot.slane %v929_v5, 4  ;;  %v955_v54 = vsel %vm528_vm1, %v954_v13, %v905_v60 }
 0x170   : > { %v992_v63 = vrot.slane %v949_v9, 4  ;;  %v994_v8 = vrot.slane %v977_v40, 4  ;;  %v996_v21 = vrot.slane %v953_v4, 4  ;;  %v961_v29 = vperm.slane %v955_v54, %v2871_v41 }
 0x171   : > { %v990_v26 = vrot.slane %v973_v15, 4  ;;  %v979_v30 = vsel %vm528_vm1, %v978_v19, %v929_v5  ;;  %v957_v33 = vsel %vm528_vm1, %v917_v61, %v956_v38  ;;  %v981_v2 = vsel %vm528_vm1, %v941_v62, %v980_v6 }
 0x172   : > { %v993_v35 = vsel %vm528_vm1, %v973_v15, %v992_v63  ;;  %v995_v56 = vsel %vm528_vm1, %v994_v8, %v953_v4  ;;  %v985_v36 = vperm.slane %v979_v30, %v2871_v41  ;;  %v997_v37 = vsel %vm528_vm1, %v977_v40, %v996_v21 }
 0x173   : > { %v991_v39 = vsel %vm528_vm1, %v990_v26, %v949_v9  ;;  %v1007_v44 = vpack.c.bf16 %v993_v35, %v993_v35  ;;  %v1008_v46 = vpack.c.bf16 %v995_v56, %v995_v56  ;;  %v1009_v28 = vpack.c.bf16 %v997_v37, %v997_v37 }
 0x174   : > { %v1006_v31 = vpack.c.bf16 %v991_v39, %v991_v39  ;;  %v998_v52 = vrot.slane %v985_v36, 4  ;;  %v1000_v58 = vrot.slane %v961_v29, 4  ;;  %v965_v59 = vperm.slane %v957_v33, %v2871_v41 }
 0x175   : > { %v1294_v60 = vsel %vm1270_vm2, %v1007_v44, 0  ;;  %v1313_v61 = vsel %vm1270_vm2, %v1008_v46, 0  ;;  %v1332_v1 = vsel %vm1270_vm2, %v1009_v28, 0  ;;  %v989_v57 = vperm.slane %v981_v2, %v2871_v41 }
 0x176   : > { %v1275_v0 = vsel %vm1270_vm2, %v1006_v31, 0  ;;  %1303 = vmatpush.bf16.xpose.msra.mxu3 %v1294_v60  ;;  %1322 = vmatpush.bf16.xpose.msrb.mxu0 %v1313_v61  ;;  %v999_v49 = vsel %vm528_vm1, %v998_v52, %v961_v29  ;;  %v1001_v4 = vsel %vm528_vm1, %v985_v36, %v1000_v58  ;;  %v1004_v55 = vrot.slane %v965_v59, 4 }
 0x177   : > { %1284 = vmatpush.bf16.xpose.msra.mxu2 %v1275_v0  ;;  %v1010_v5 = vpack.c.bf16 %v999_v49, %v999_v49  ;;  %1341 = vmatpush.bf16.xpose.msrb.mxu1 %v1332_v1  ;;  %v1011_v9 = vpack.c.bf16 %v1001_v4, %v1001_v4  ;;  %v625_v62 = vsel %vm528_vm1, %v624_v42, %v2932_v34  ;;  %v1002_v40 = vrot.slane %v989_v57, 4 }
 0x178   : > { %v640_v13 = vrot.slane %v3026_v18, 4  ;;  %v642_v15 = vrot.slane %v625_v62, 4  ;;  %v653_v38 = vsel %vm528_vm1, %v652_v23, %v3002_v48  ;;  %v1005_v63 = vsel %vm528_vm1, %v989_v57, %v1004_v55 }
 0x179   : > { %v1351_v19 = vsel %vm1270_vm2, %v1010_v5, 0  ;;  %v1370_v6 = vsel %vm1270_vm2, %v1011_v9, 0  ;;  %v659_v8 = vperm.slane %v653_v38, %v2862_v32  ;;  %v1003_v34 = vsel %vm528_vm1, %v1002_v40, %v965_v59 }
 0x17a   : > { %v1013_v50 = vpack.c.bf16 %v1005_v63, %v1005_v63  ;;  %v641_v42 = vsel %vm528_vm1, %v640_v13, %v625_v62  ;;  %v712_v54 = vrot.slane %v3050_v51, 4  ;;  %v1012_v7 = vpack.c.bf16 %v1003_v34, %v1003_v34 }
 0x17b   : > { %v647_v48 = vperm.slane %v641_v42, %v2862_v32  ;;  %v665_v23 = vsel %vm528_vm1, %v664_v20, %v3030_v12  ;;  %v688_v21 = vrot.slane %v659_v8, 4  ;;  %v667_v26 = vsel %vm528_vm1, %v3017_v10, %v666_v22 }
 0x17c   : > { %v1408_v29 = vsel %vm1270_vm2, %v1013_v50, 0  ;;  %v671_v30 = vperm.slane %v665_v23, %v2862_v32  ;;  %v643_v33 = vsel %vm528_vm1, %v3026_v18, %v642_v15  ;;  %v1389_v35 = vsel %vm1270_vm2, %v1012_v7, 0 }
 0x17d   : > { %v689_v56 = vsel %vm528_vm1, %v688_v21, %v647_v48  ;;  %v690_v36 = vrot.slane %v647_v48, 4  ;;  %v663_v20 = vperm.slane %v3035_v43, %v2862_v32  ;;  %v687_v12 = vperm.slane %v3045_v25, %v2862_v32 }
 0x17e   : > { %1379 = vmatpush.bf16.xpose.msrb.mxu3 %v1370_v6  ;;  %1398 = vmatpush.bf16.xpose.msra.mxu0 %v1389_v35  ;;  %v695_v10 = vperm.slane %v689_v56, %v2871_v41  ;;  %v713_v22 = vsel %vm528_vm1, %v712_v54, %v671_v30  ;;  %v714_v37 = vrot.slane %v671_v30, 4  ;;  %v651_v44 = vperm.slane %v643_v33, %v2862_v32 }
 0x17f   : > { %1360 = vmatpush.bf16.xpose.msrb.mxu2 %v1351_v19  ;;  %1417 = vmatpush.bf16.xpose.msra.mxu1 %v1408_v29  ;;  %v719_v18 = vperm.slane %v713_v22, %v2871_v41  ;;  %v691_v39 = vsel %vm528_vm1, %v659_v8, %v690_v36  ;;  %v675_v46 = vperm.slane %v667_v26, %v2862_v32  ;;  %v700_v58 = vrot.slane %v663_v20, 4 }
 0x180   : > { %v738_v28 = vrot.slane %v695_v10, 4  ;;  %v699_v43 = vperm.slane %v691_v39, %v2871_v41  ;;  %v715_v25 = vsel %vm528_vm1, %v3050_v51, %v714_v37  ;;  %v724_v59 = vrot.slane %v687_v12, 4 }
 0x181   : > { %v736_v31 = vrot.slane %v719_v18, 4  ;;  %v723_v52 = vperm.slane %v715_v25, %v2871_v41  ;;  %v702_v49 = vrot.slane %v651_v44, 4  ;;  %v726_v4 = vrot.slane %v675_v46, 4 }
 0x182   : > { %v739_v60 = vsel %vm528_vm1, %v719_v18, %v738_v28  ;;  %v742_v61 = vrot.slane %v699_v43, 4  ;;  %v701_v55 = vsel %vm528_vm1, %v700_v58, %v651_v44  ;;  %v725_v40 = vsel %vm528_vm1, %v724_v59, %v675_v46 }
 0x183   : > { %v737_v1 = vsel %vm528_vm1, %v736_v31, %v695_v10  ;;  %v753_v2 = vpack.c.bf16 %v739_v60, %v739_v60  ;;  %v740_v0 = vrot.slane %v723_v52, 4  ;;  %v703_v13 = vsel %vm528_vm1, %v663_v20, %v702_v49 }
 0x184   : > { %v752_v57 = vpack.c.bf16 %v737_v1, %v737_v1  ;;  %v743_v5 = vsel %vm528_vm1, %v723_v52, %v742_v61  ;;  %v707_v15 = vperm.slane %v701_v55, %v2871_v41  ;;  %v727_v38 = vsel %vm528_vm1, %v687_v12, %v726_v4 }
 0x185   : > { %2160 = vmatmul.msk.bf16.vlgmr.msra.gmra.mxu3 %vm1270_vm2, %v753_v2  ;;  %v741_v51 = vsel %vm528_vm1, %v740_v0, %v699_v43  ;;  %v755_v9 = vpack.c.bf16 %v743_v5, %v743_v5  ;;  %v731_v19 = vperm.slane %v725_v40, %v2871_v41  ;;  %v711_v6 = vperm.slane %v703_v13, %v2871_v41 }
 0x186   : > { %2159 = vmatmul.msk.bf16.vlgmr.msra.gmra.mxu2 %vm1270_vm2, %v752_v57  ;;  %v754_v62 = vpack.c.bf16 %v741_v51, %v741_v51  ;;  %v735_v63 = vperm.slane %v727_v38, %v2871_v41  ;;  %v746_v8 = vrot.slane %v707_v15, 4  ;;  %v2331_v0 = vpack.i.bf16 %v2859_v27, %v2841_v11 }
 0x187   : > { %2162 = vmatmul.msk.bf16.vlgmr.msrb.gmra.mxu1 %vm1270_vm2, %v755_v9  ;;  %v744_v34 = vrot.slane %v731_v19, 4  ;;  %v750_v50 = vrot.slane %v711_v6, 4  ;;  %v2341_v49 = vpack.i.bf16 %v2853_v16, %v2874_v45 }
 0x188   : > { %2161 = vmatmul.msk.bf16.vlgmr.msrb.gmra.mxu0 %vm1270_vm2, %v754_v62  ;;  %v748_v42 = vrot.slane %v735_v63, 4  ;;  %v747_v54 = vsel %vm528_vm1, %v731_v19, %v746_v8 }
 0x189   : > { %v745_v7 = vsel %vm528_vm1, %v744_v34, %v707_v15  ;;  %v751_v48 = vsel %vm528_vm1, %v735_v63, %v750_v50  ;;  %v757_v23 = vpack.c.bf16 %v747_v54, %v747_v54 }
 0x18a   : > { %v749_v21 = vsel %vm528_vm1, %v748_v42, %v711_v6  ;;  %v756_v26 = vpack.c.bf16 %v745_v7, %v745_v7  ;;  %v759_v29 = vpack.c.bf16 %v751_v48, %v751_v48 }
 0x18b   : > { %v758_v30 = vpack.c.bf16 %v749_v21, %v749_v21 }
 0x195   : > { %2164 = vmatmul.msk.bf16.vlgmr.msrb.gmra.mxu3 %vm1270_vm2, %v757_v23 }
 0x196   : > { %2163 = vmatmul.msk.bf16.vlgmr.msrb.gmra.mxu2 %vm1270_vm2, %v756_v26 }
 0x197   : > { %2166 = vmatmul.msk.bf16.vlgmr.msra.gmra.mxu1 %vm1270_vm2, %v759_v29 }
 0x198   : > { %2165 = vmatmul.msk.bf16.vlgmr.msra.gmra.mxu0 %vm1270_vm2, %v758_v30 }
 0x204   : > { %v1343_v33 = vpop.f32.mrf.mxu1 }
 0x205   : > { %v1324_v35 = vpop.f32.mrf.mxu0  ;;  %v1433_v56 = vsel %vm1423_vm3, %v1343_v33, -inf }
 0x206   : > { %v1430_v36 = vsel %vm1423_vm3, %v1324_v35, -inf  ;;  %1434 = vmax.xlane.f32.xlu2 %v1433_v56 }
 0x207   : > { %1431 = vmax.xlane.f32.xlu0 %v1430_v36 }
 0x208   : > { %v1305_v20 = vpop.f32.mrf.mxu3 }
 0x209   : > { %v1286_v12 = vpop.f32.mrf.mxu2  ;;  %v1427_v18 = vsel %vm1423_vm3, %v1305_v20, -inf }
 0x20a   : > { %v1424_v10 = vsel %vm1423_vm3, %v1286_v12, -inf }
 0x20b   : > { %1425 = vmax.xlane.f32.xlu1 %v1424_v10 }
 0x20c   : > { %v1345_v22 = vpop.f32.mrf.mxu1 }
 0x20d   : > { %v1326_v37 = vpop.f32.mrf.mxu0 }
 0x20e   : > { %1428 = vmax.xlane.f32.xlu2 %v1427_v18 }
 0x210   : > { %v1307_v39 = vpop.f32.mrf.mxu3 }
 0x211   : > { %v1288_v44 = vpop.f32.mrf.mxu2 }
 0x214   : > { %v3163_v46 = vpop.f32.mrf.mxu1 }
 0x215   : > { %v1400_v28 = vpop.f32.mrf.mxu0  ;;  %v1445_v43 = vsel %vm1423_vm3, %v3163_v46, -inf }
 0x216   : > { %v1442_v25 = vsel %vm1423_vm3, %v1400_v28, -inf  ;;  %1446 = vmax.xlane.f32.xlu1 %v1445_v43 }
 0x217   : > { %1443 = vmax.xlane.f32.xlu0 %v1442_v25 }
 0x218   : > { %v1381_v31 = vpop.f32.mrf.mxu3 }
 0x219   : > { %v1362_v52 = vpop.f32.mrf.mxu2  ;;  %v1439_v58 = vsel %vm1423_vm3, %v1381_v31, -inf }
 0x21a   : > { %1440 = vmax.xlane.f32.xlu2 %v1439_v58  ;;  %v1436_v61 = vsel %vm1423_vm3, %v1362_v52, -inf }
 0x21c   : > { %v1421_v59 = vpop.f32.mrf.mxu1 }
 0x21d   : > { %v1402_v60 = vpop.f32.mrf.mxu0 }
 0x21e   : > { %1437 = vmax.xlane.f32.xlu1 %v1436_v61 }
 0x220   : > { %v1383_v1 = vpop.f32.mrf.mxu3 }
 0x221   : > { %v1364_v2 = vpop.f32.mrf.mxu2 }
 0x22b   : > { %2337 = vrot.lane.b32.xlu0 %v2336_v3, %s2646_s14 }
 0x232   : > { %2332 = vrot.lane.b32.xlu2 %v2331_v0, %s2646_s14 }
 0x233   : > { %2347 = vrot.lane.b32.xlu0 %v2346_v53, %s2646_s14 }
 0x237   : > { %2342 = vrot.lane.b32.xlu1 %v2341_v49, %s2646_s14 }
 0x279   : > { %v1435_v4 = vpop.xlane.xlu2 %1434 }
 0x27a   : > { %v1432_v57 = vpop.xlane.xlu0 %1431  ;;  %v1451_v47 = vsub.f32 %v1343_v33, %v1435_v4 }
 0x27b   : > { %v1450_v5 = vsub.f32 %v1324_v35, %v1432_v57 }
 0x27c   : > { %v1462_v17 = vmul.f32 1.442695, %v1451_v47 }
 0x27d   : > { %v1460_v51 = vmul.f32 1.442695, %v1450_v5 }
 0x27e   : > { %v1426_v9 = vpop.xlane.xlu1 %1425 }
 0x27f   : > { %2354 = vpow2.f32 %v1460_v51  ;;  %v1448_v24 = vsub.f32 %v1286_v12, %v1426_v9 }
 0x281   : > { %v1456_v3 = vmul.f32 1.442695, %v1448_v24  ;;  %v1429_v55 = vpop.xlane.xlu2 %1428 }
 0x282   : > { %v1449_v11 = vsub.f32 %v1305_v20, %v1429_v55 }
 0x283   : > { %2356 = vpow2.f32 %v1456_v3 }
 0x284   : > { %v1458_v27 = vmul.f32 1.442695, %v1449_v11 }
 0x285   : > { %v3180_v62 = vpop.eup %2354 }
 0x286   : > { %2358 = vpow2.f32 %v1458_v27  ;;  %v1478_v16 = vsel %vm1423_vm3, %v3180_v62, 0.0 }
 0x287   : > { %1479 = vadd.xlane.f32.xlu0 %v1478_v16  ;;  %2360 = vpow2.f32 %v1462_v17 }
 0x289   : > { %v3184_v45 = vpop.eup %2356  ;;  %v1447_v14 = vpop.xlane.xlu1 %1446 }
 0x28a   : > { %v1444_v53 = vpop.xlane.xlu0 %1443  ;;  %v1472_v40 = vsel %vm1423_vm3, %v3184_v45, 0.0  ;;  %v1455_v7 = vsub.f32 %v3163_v46, %v1447_v14 }
 0x28b   : > { %v1454_v13 = vsub.f32 %v1400_v28, %v1444_v53  ;;  %1473 = vadd.xlane.f32.xlu2 %v1472_v40 }
 0x28c   : > { %v3188_v15 = vpop.eup %2358  ;;  %v1470_v26 = vmul.f32 1.442695, %v1455_v7 }
 0x28d   : > { %v1468_v38 = vmul.f32 1.442695, %v1454_v13  ;;  %v1441_v19 = vpop.xlane.xlu2 %1440  ;;  %v1475_v6 = vsel %vm1423_vm3, %v3188_v15, 0.0  ;;  %v3192_v8 = vpop.eup %2360 }
 0x28e   : > { %v1453_v63 = vsub.f32 %v1381_v31, %v1441_v19  ;;  %1476 = vadd.xlane.f32.xlu1 %v1475_v6  ;;  %v1481_v42 = vsel %vm1423_vm3, %v3192_v8, 0.0 }
 0x28f   : > { %2362 = vpow2.f32 %v1468_v38 }
 0x290   : > { %v1466_v34 = vmul.f32 1.442695, %v1453_v63 }
 0x291   : > { %v1438_v50 = vpop.xlane.xlu1 %1437 }
 0x292   : > { %2364 = vpow2.f32 %v1466_v34  ;;  %v1452_v54 = vsub.f32 %v1362_v52, %v1438_v50 }
 0x293   : > { %1482 = vadd.xlane.f32.xlu2 %v1481_v42 }
 0x294   : > { %v1464_v48 = vmul.f32 1.442695, %v1452_v54 }
 0x295   : > { %v3197_v23 = vpop.eup %2362  ;;  %v2333_v35 = vpop.permute.xlu2 %2332 }
 0x296   : > { %2366 = vpow2.f32 %v1464_v48  ;;  %v1490_v30 = vsel %vm1423_vm3, %v3197_v23, 0.0  ;;  %v2334_v20 = vunpack.i.l.bf16 %v2333_v35  ;;  %v2335_v39 = vunpack.i.h.bf16 %v2333_v35 }
 0x297   : > { %2368 = vpow2.f32 %v1470_v26 }
 0x298   : > { %v3199_v21 = vpop.eup %2364  ;;  %v1040_v37 = vrot.slane %v2334_v20, 4  ;;  %v1052_v60 = vrot.slane %v2335_v39, 4 }
 0x299   : > { %v1487_v29 = vsel %vm1423_vm3, %v3199_v21, 0.0 }
 0x29a   : > { %1488 = vadd.xlane.f32.xlu0 %v1487_v29 }
 0x29b   : > { %1491 = vadd.xlane.f32.xlu2 %v1490_v30 }
 0x29c   : > { %v3205_v33 = vpop.eup %2366 }
 0x29d   : > { %v2338_v56 = vpop.permute.xlu0 %2337  ;;  %v1484_v36 = vsel %vm1423_vm3, %v3205_v33, 0.0  ;;  %v3209_v10 = vpop.eup %2368 }
 0x29e   : > { %1485 = vadd.xlane.f32.xlu1 %v1484_v36  ;;  %v2339_v12 = vunpack.i.l.bf16 %v2338_v56  ;;  %v2340_v22 = vunpack.i.h.bf16 %v2338_v56  ;;  %v1493_v46 = vsel %vm1423_vm3, %v3209_v10, 0.0 }
 0x2a0   : > { %v1038_v18 = vrot.slane %v2339_v12, 4  ;;  %v1064_v28 = vrot.slane %v2340_v22, 4  ;;  %v1041_v43 = vsel %vm528_vm1, %v2339_v12, %v1040_v37 }
 0x2a1   : > { %v1049_v61 = vperm.slane %v1041_v43, %v2862_v32 }
 0x2a2   : > { %v1039_v52 = vsel %vm528_vm1, %v1038_v18, %v2334_v20 }
 0x2a3   : > { %v1045_v5 = vperm.slane %v1039_v52, %v2862_v32  ;;  %v1100_v17 = vrot.slane %v1049_v61, 4 }
 0x2a5   : > { %v2348_v44 = vpop.permute.xlu0 %2347  ;;  %v1088_v6 = vrot.slane %v1045_v5, 4 }
 0x2a6   : > { %v2350_v25 = vunpack.i.h.bf16 %v2348_v44  ;;  %v2349_v31 = vunpack.i.l.bf16 %v2348_v44  ;;  %1494 = vadd.xlane.f32.xlu1 %v1493_v46 }
 0x2a8   : > { %v1062_v58 = vrot.slane %v2349_v31, 4  ;;  %v1065_v59 = vsel %vm528_vm1, %v2349_v31, %v1064_v28  ;;  %v1074_v1 = vrot.slane %v2350_v25, 4 }
 0x2a9   : > { %v2343_v2 = vpop.permute.xlu1 %2342  ;;  %v1073_v49 = vperm.slane %v1065_v59, %v2862_v32 }
 0x2aa   : > { %v1063_v0 = vsel %vm528_vm1, %v1062_v58, %v2340_v22  ;;  %v2345_v4 = vunpack.i.h.bf16 %v2343_v2  ;;  %v2344_v57 = vunpack.i.l.bf16 %v2343_v2 }
 0x2ab   : > { %v1069_v51 = vperm.slane %v1063_v0, %v2862_v32  ;;  %v1124_v16 = vrot.slane %v1073_v49, 4 }
 0x2ac   : > { %v1075_v9 = vsel %vm528_vm1, %v1074_v1, %v2345_v4  ;;  %v1076_v24 = vrot.slane %v2345_v4, 4  ;;  %v1050_v47 = vrot.slane %v2344_v57, 4  ;;  %v1053_v3 = vsel %vm528_vm1, %v2344_v57, %v1052_v60 }
 0x2ad   : > { %v1112_v55 = vrot.slane %v1069_v51, 4  ;;  %v1081_v11 = vperm.slane %v1075_v9, %v2862_v32  ;;  %v1061_v27 = vperm.slane %v1053_v3, %v2862_v32 }
 0x2ae   : > { %v1077_v14 = vsel %vm528_vm1, %v2350_v25, %v1076_v24  ;;  %v1051_v53 = vsel %vm528_vm1, %v1050_v47, %v2335_v39 }
 0x2af   : > { %v1085_v40 = vperm.slane %v1077_v14, %v2862_v32  ;;  %v1110_v13 = vrot.slane %v1081_v11, 4  ;;  %v1113_v38 = vsel %vm528_vm1, %v1081_v11, %v1112_v55  ;;  %v1057_v19 = vperm.slane %v1051_v53, %v2862_v32 }
 0x2b0   : > { %v1121_v63 = vperm.slane %v1113_v38, %v2871_v41  ;;  %v1098_v34 = vrot.slane %v1061_v27, 4  ;;  %v1101_v50 = vsel %vm528_vm1, %v1061_v27, %v1100_v17 }
 0x2b1   : > { %v1111_v42 = vsel %vm528_vm1, %v1110_v13, %v1069_v51  ;;  %v1122_v54 = vrot.slane %v1085_v40, 4  ;;  %v1125_v7 = vsel %vm528_vm1, %v1085_v40, %v1124_v16  ;;  %v1086_v48 = vrot.slane %v1057_v19, 4 }
 0x2b2   : > { %v1117_v26 = vperm.slane %v1111_v42, %v2871_v41  ;;  %v1133_v29 = vperm.slane %v1125_v7, %v2871_v41  ;;  %v1138_v30 = vrot.slane %v1121_v63, 4  ;;  %v1089_v35 = vsel %vm528_vm1, %v1057_v19, %v1088_v6 }
 0x2b3   : > { %v1123_v56 = vsel %vm528_vm1, %v1122_v54, %v1073_v49  ;;  %v1087_v36 = vsel %vm528_vm1, %v1086_v48, %v1045_v5  ;;  %v1097_v20 = vperm.slane %v1089_v35, %v2871_v41  ;;  %v1099_v12 = vsel %vm528_vm1, %v1098_v34, %v1049_v61 }
 0x2b4   : > { %v1129_v22 = vperm.slane %v1123_v56, %v2871_v41  ;;  %v1134_v37 = vrot.slane %v1117_v26, 4  ;;  %v1146_v18 = vrot.slane %v1133_v29, 4  ;;  %v1093_v39 = vperm.slane %v1087_v36, %v2871_v41 }
 0x2b5   : > { %v1105_v44 = vperm.slane %v1099_v12, %v2871_v41  ;;  %v1109_v46 = vperm.slane %v1101_v50, %v2871_v41  ;;  %v1139_v28 = vsel %vm528_vm1, %v1138_v30, %v1097_v20  ;;  %v1140_v43 = vrot.slane %v1097_v20, 4 }
 0x2b6   : > { %v1142_v25 = vrot.slane %v1129_v22, 4  ;;  %v1136_v31 = vrot.slane %v1093_v39, 4  ;;  %v1150_v52 = vrot.slane %v1139_v28, 4  ;;  %v1135_v58 = vsel %vm528_vm1, %v1134_v37, %v1093_v39 }
 0x2b7   : > { %v1141_v59 = vsel %vm528_vm1, %v1121_v63, %v1140_v43  ;;  %v1144_v60 = vrot.slane %v1105_v44, 4  ;;  %v1147_v61 = vsel %vm528_vm1, %v1146_v18, %v1109_v46  ;;  %v1148_v1 = vrot.slane %v1109_v46, 4 }
 0x2b8   : > { %v1137_v2 = vsel %vm528_vm1, %v1117_v26, %v1136_v31  ;;  %v1143_v0 = vsel %vm528_vm1, %v1142_v25, %v1105_v44  ;;  %v1162_v49 = vrot.slane %v1141_v59, 4  ;;  %v1174_v4 = vrot.slane %v1147_v61, 4 }
 0x2b9   : > { %v1145_v57 = vsel %vm528_vm1, %v1129_v22, %v1144_v60  ;;  %v1149_v5 = vsel %vm528_vm1, %v1133_v29, %v1148_v1  ;;  %v1164_v51 = vrot.slane %v1137_v2, 4  ;;  %v1176_v9 = vrot.slane %v1143_v0, 4 }
 0x2ba   : > { %v1186_v24 = vrot.slane %v1149_v5, 4  ;;  %v1188_v47 = vrot.slane %v1145_v57, 4  ;;  %v1151_v3 = vsel %vm528_vm1, %v1150_v52, %v1135_v58  ;;  %v1152_v55 = vrot.slane %v1135_v58, 4 }
 0x2bb   : > { %v1157_v11 = vperm.slane %v1151_v3, %v2862_v32  ;;  %v1163_v27 = vsel %vm528_vm1, %v1162_v49, %v1137_v2  ;;  %v1175_v17 = vsel %vm528_vm1, %v1174_v4, %v1143_v0  ;;  %v1165_v16 = vsel %vm528_vm1, %v1141_v59, %v1164_v51 }
 0x2bc   : > { %v1169_v14 = vperm.slane %v1163_v27, %v2862_v32  ;;  %v1181_v53 = vperm.slane %v1175_v17, %v2862_v32  ;;  %v1187_v40 = vsel %vm528_vm1, %v1186_v24, %v1145_v57  ;;  %v1153_v13 = vsel %vm528_vm1, %v1139_v28, %v1152_v55 }
 0x2bd   : > { %v1193_v38 = vperm.slane %v1187_v40, %v2862_v32  ;;  %v1200_v19 = vrot.slane %v1157_v11, 4  ;;  %v1161_v6 = vperm.slane %v1153_v13, %v2862_v32  ;;  %v1173_v63 = vperm.slane %v1165_v16, %v2862_v32 }
 0x2be   : > { %v1198_v34 = vrot.slane %v1169_v14, 4  ;;  %v1224_v50 = vrot.slane %v1181_v53, 4  ;;  %v1177_v42 = vsel %vm528_vm1, %v1147_v61, %v1176_v9  ;;  %v1189_v54 = vsel %vm528_vm1, %v1149_v5, %v1188_v47 }
 0x2bf   : > { %v1222_v7 = vrot.slane %v1193_v38, 4  ;;  %v1201_v48 = vsel %vm528_vm1, %v1169_v14, %v1200_v19  ;;  %v1185_v26 = vperm.slane %v1177_v42, %v2862_v32  ;;  %v1197_v29 = vperm.slane %v1189_v54, %v2862_v32 }
 0x2c0   : > { %v1199_v30 = vsel %vm528_vm1, %v1198_v34, %v1157_v11  ;;  %v1209_v35 = vperm.slane %v1201_v48, %v2871_v41  ;;  %v1225_v56 = vsel %vm528_vm1, %v1193_v38, %v1224_v50  ;;  %v1210_v36 = vrot.slane %v1173_v63, 4 }
 0x2c1   : > { %v1205_v20 = vperm.slane %v1199_v30, %v2871_v41  ;;  %v1223_v12 = vsel %vm528_vm1, %v1222_v7, %v1181_v53  ;;  %v1233_v22 = vperm.slane %v1225_v56, %v2871_v41  ;;  %v1234_v37 = vrot.slane %v1197_v29, 4 }
 0x2c2   : > { %v1229_v18 = vperm.slane %v1223_v12, %v2871_v41  ;;  %v1252_v39 = vrot.slane %v1209_v35, 4  ;;  %v1211_v44 = vsel %vm528_vm1, %v1210_v36, %v1161_v6  ;;  %v1212_v46 = vrot.slane %v1161_v6, 4 }
 0x2c3   : > { %v1248_v28 = vrot.slane %v1205_v20, 4  ;;  %v1250_v43 = vrot.slane %v1233_v22, 4  ;;  %v1217_v25 = vperm.slane %v1211_v44, %v2871_v41  ;;  %v1235_v31 = vsel %vm528_vm1, %v1234_v37, %v1185_v26 }
 0x2c4   : > { %v1246_v52 = vrot.slane %v1229_v18, 4  ;;  %v1253_v58 = vsel %vm528_vm1, %v1233_v22, %v1252_v39  ;;  %v1241_v59 = vperm.slane %v1235_v31, %v2871_v41  ;;  %v1213_v60 = vsel %vm528_vm1, %v1173_v63, %v1212_v46 }
 0x2c5   : > { %v1265_v61 = vpack.c.bf16 %v1253_v58, %v1253_v58  ;;  %v1249_v1 = vsel %vm528_vm1, %v1229_v18, %v1248_v28  ;;  %v1251_v2 = vsel %vm528_vm1, %v1250_v43, %v1209_v35  ;;  %v1221_v0 = vperm.slane %v1213_v60, %v2871_v41 }
 0x2c6   : > { %v1247_v49 = vsel %vm528_vm1, %v1246_v52, %v1205_v20  ;;  %v1263_v4 = vpack.c.bf16 %v1249_v1, %v1249_v1  ;;  %v1264_v57 = vpack.c.bf16 %v1251_v2, %v1251_v2  ;;  %v1254_v5 = vrot.slane %v1241_v59, 4 }
 0x2c7   : > { %v1262_v51 = vpack.c.bf16 %v1247_v49, %v1247_v49  ;;  %v1582_v9 = vsel %vm1523_vm4, %v1265_v61, 0  ;;  %v1236_v24 = vrot.slane %v1185_v26, 4  ;;  %v1260_v47 = vrot.slane %v1221_v0, 4 }
 0x2c8   : > { %1591 = vmatpush.bf16.msrb.mxu1 %v1582_v9  ;;  %v1544_v3 = vsel %vm1523_vm4, %v1263_v4, 0  ;;  %v1563_v55 = vsel %vm1523_vm4, %v1264_v57, 0  ;;  %v1255_v11 = vsel %vm528_vm1, %v1254_v5, %v1217_v25  ;;  %v1256_v27 = vrot.slane %v1217_v25, 4 }
 0x2c9   : > { %v1525_v17 = vsel %vm1523_vm4, %v1262_v51, 0  ;;  %1553 = vmatpush.bf16.msra.mxu3 %v1544_v3  ;;  %1572 = vmatpush.bf16.msrb.mxu0 %v1563_v55  ;;  %v1266_v16 = vpack.c.bf16 %v1255_v11, %v1255_v11  ;;  %v1237_v14 = vsel %vm528_vm1, %v1197_v29, %v1236_v24 }
 0x2ca   : > { %1534 = vmatpush.bf16.msra.mxu2 %v1525_v17  ;;  %v1245_v53 = vperm.slane %v1237_v14, %v2871_v41  ;;  %v1257_v40 = vsel %vm528_vm1, %v1241_v59, %v1256_v27 }
 0x2cb   : > { %v1601_v13 = vsel %vm1523_vm4, %v1266_v16, 0  ;;  %v1267_v38 = vpack.c.bf16 %v1257_v40, %v1257_v40 }
 0x2cc   : > { %v1261_v19 = vsel %vm528_vm1, %v1245_v53, %v1260_v47  ;;  %v1258_v6 = vrot.slane %v1245_v53, 4 }
 0x2cd   : > { %v1269_v63 = vpack.c.bf16 %v1261_v19, %v1261_v19  ;;  %v1620_v34 = vsel %vm1523_vm4, %v1267_v38, 0 }
 0x2ce   : > { %1610 = vmatpush.bf16.msrb.mxu2 %v1601_v13  ;;  %1629 = vmatpush.bf16.msrb.mxu3 %v1620_v34  ;;  %v1259_v50 = vsel %vm528_vm1, %v1258_v6, %v1221_v0 }
 0x2cf   : > { %v1658_v42 = vsel %vm1523_vm4, %v1269_v63, 0  ;;  %v1268_v54 = vpack.c.bf16 %v1259_v50, %v1259_v50 }
 0x2d0   : > { %1667 = vmatpush.bf16.msra.mxu1 %v1658_v42 }
 0x2d1   : > { %v1639_v7 = vsel %vm1523_vm4, %v1268_v54, 0 }
 0x2d2   : > { %1648 = vmatpush.bf16.msra.mxu0 %v1639_v7 }
 0x2fa   : > { %v1480_v48 = vpop.xlane.xlu0 %1479 }
 0x2fb   : > { %2370 = vrcp.f32 %v1480_v48 }
 0x2fe   : > { %v1474_v26 = vpop.xlane.xlu2 %1473 }
 0x2ff   : > { %2372 = vrcp.f32 %v1474_v26 }
 0x301   : > { %v2371_v29 = vpop.eup %2370  ;;  %v1477_v30 = vpop.xlane.xlu1 %1476 }
 0x302   : > { %v1506_v35 = vmul.f32 %v2371_v29, %v3180_v62  ;;  %2374 = vrcp.f32 %v1477_v30 }
 0x304   : > { %v1514_v56 = vpack.c.bf16 %v1506_v35, %v1506_v35 }
 0x305   : > { %v2373_v36 = vpop.eup %2372 }
 0x306   : > { %v1504_v20 = vmul.f32 %v2373_v36, %v3184_v45  ;;  %v1483_v12 = vpop.xlane.xlu2 %1482  ;;  %2169 = vmatmul.msk.bf16.vlgmr.msrb.gmra.mxu0 %vm1423_vm3, %v1514_v56 }
 0x307   : > { %2376 = vrcp.f32 %v1483_v12 }
 0x308   : > { %v2375_v22 = vpop.eup %2374  ;;  %v1512_v37 = vpack.c.bf16 %v1504_v20, %v1504_v20 }
 0x309   : > { %v1505_v18 = vmul.f32 %v2375_v22, %v3188_v15 }
 0x30a   : > { %2167 = vmatmul.msk.bf16.vlgmr.msra.gmra.mxu2 %vm1423_vm3, %v1512_v37 }
 0x30b   : > { %v1513_v39 = vpack.c.bf16 %v1505_v18, %v1505_v18 }
 0x30d   : > { %v2377_v44 = vpop.eup %2376  ;;  %v1489_v46 = vpop.xlane.xlu0 %1488  ;;  %2168 = vmatmul.msk.bf16.vlgmr.msra.gmra.mxu3 %vm1423_vm3, %v1513_v39 }
 0x30e   : > { %v1507_v62 = vmul.f32 %v2377_v44, %v3192_v8  ;;  %v1492_v28 = vpop.xlane.xlu2 %1491  ;;  %2378 = vrcp.f32 %v1489_v46 }
 0x30f   : > { %2380 = vrcp.f32 %v1492_v28 }
 0x310   : > { %v1515_v45 = vpack.c.bf16 %v1507_v62, %v1507_v62 }
 0x311   : > { %v1486_v43 = vpop.xlane.xlu1 %1485 }
 0x312   : > { %2170 = vmatmul.msk.bf16.vlgmr.msrb.gmra.mxu1 %vm1423_vm3, %v1515_v45  ;;  %2382 = vrcp.f32 %v1486_v43 }
 0x314   : > { %v2379_v25 = vpop.eup %2378 }
 0x315   : > { %v2381_v31 = vpop.eup %2380  ;;  %v1509_v52 = vmul.f32 %v2379_v25, %v3199_v21 }
 0x316   : > { %v1510_v15 = vmul.f32 %v2381_v31, %v3197_v23 }
 0x317   : > { %v1517_v8 = vpack.c.bf16 %v1509_v52, %v1509_v52 }
 0x318   : > { %v2383_v58 = vpop.eup %2382  ;;  %v1518_v59 = vpack.c.bf16 %v1510_v15, %v1510_v15 }
 0x319   : > { %v1508_v60 = vmul.f32 %v2383_v58, %v3205_v33  ;;  %v1495_v61 = vpop.xlane.xlu1 %1494 }
 0x31a   : > { %2173 = vmatmul.msk.bf16.vlgmr.msra.gmra.mxu0 %vm1423_vm3, %v1518_v59  ;;  %2384 = vrcp.f32 %v1495_v61 }
 0x31b   : > { %v1516_v1 = vpack.c.bf16 %v1508_v60, %v1508_v60 }
 0x31d   : > { %2171 = vmatmul.msk.bf16.vlgmr.msrb.gmra.mxu2 %vm1423_vm3, %v1516_v1  ;;  %2172 = vmatmul.msk.bf16.vlgmr.msrb.gmra.mxu3 %vm1423_vm3, %v1517_v8 }
 0x320   : > { %v2385_v2 = vpop.eup %2384 }
 0x321   : > { %v1511_v0 = vmul.f32 %v2385_v2, %v3209_v10 }
 0x323   : > { %v1519_v23 = vpack.c.bf16 %v1511_v0, %v1511_v0 }
 0x325   : > { %2174 = vmatmul.msk.bf16.vlgmr.msra.gmra.mxu1 %vm1423_vm3, %v1519_v23 }
 0x383   : > { %v1574_v21 = vpop.f32.mrf.mxu0 }
 0x384   : > { %v1673_v47 = vrot.slane %v1574_v21, 4 }
 0x38b   : > { %v1576_v49 = vpop.f32.mrf.mxu0 }
 0x38d   : > { %v1536_v4 = vpop.f32.mrf.mxu2 }
 0x38e   : > { %v1675_v51 = vrot.slane %v1536_v4, 4  ;;  %v1674_v10 = vsel %vm528_vm1, %v1673_v47, %v1536_v4 }
 0x38f   : > { %v1593_v33 = vpop.f32.mrf.mxu1  ;;  %v1680_v40 = vperm.slane %v1674_v10, %v2862_v32 }
 0x390   : > { %v1555_v57 = vpop.f32.mrf.mxu3  ;;  %v1685_v9 = vrot.slane %v1593_v33, 4  ;;  %v1676_v16 = vsel %vm528_vm1, %v1574_v21, %v1675_v51 }
 0x391   : > { %v1687_v5 = vrot.slane %v1555_v57, 4  ;;  %v1684_v13 = vperm.slane %v1676_v16, %v2862_v32  ;;  %v1723_v6 = vrot.slane %v1680_v40, 4 }
 0x392   : > { %v1686_v3 = vsel %vm528_vm1, %v1685_v9, %v1555_v57 }
 0x393   : > { %v1688_v55 = vsel %vm528_vm1, %v1593_v33, %v1687_v5  ;;  %v1692_v14 = vperm.slane %v1686_v3, %v2862_v32  ;;  %v1735_v50 = vrot.slane %v1684_v13, 4 }
 0x394   : > { %v1696_v53 = vperm.slane %v1688_v55, %v2862_v32 }
 0x395   : > { %v1538_v24 = vpop.f32.mrf.mxu2  ;;  %v1721_v38 = vrot.slane %v1692_v14, 4  ;;  %v1724_v7 = vsel %vm528_vm1, %v1692_v14, %v1723_v6 }
 0x396   : > { %v1733_v19 = vrot.slane %v1696_v53, 4  ;;  %v1736_v56 = vsel %vm528_vm1, %v1696_v53, %v1735_v50  ;;  %v1732_v18 = vperm.slane %v1724_v7, %v2871_v41 }
 0x397   : > { %v1595_v11 = vpop.f32.mrf.mxu1  ;;  %v1650_v27 = vpop.f32.mrf.mxu0  ;;  %v1722_v30 = vsel %vm528_vm1, %v1721_v38, %v1680_v40  ;;  %v1744_v28 = vperm.slane %v1736_v56, %v2871_v41 }
 0x398   : > { %v1557_v17 = vpop.f32.mrf.mxu3  ;;  %v1697_v63 = vrot.slane %v1650_v27, 4  ;;  %v1734_v35 = vsel %vm528_vm1, %v1733_v19, %v1684_v13  ;;  %v1728_v46 = vperm.slane %v1722_v30, %v2871_v41  ;;  %v1775_v1 = vrot.slane %v1732_v18, 4 }
 0x399   : > { %v1740_v62 = vperm.slane %v1734_v35, %v2871_v41  ;;  %v1783_v4 = vrot.slane %v1744_v28, 4 }
 0x39a   : > { %v1771_v21 = vrot.slane %v1728_v46, 4 }
 0x39b   : > { %v1779_v49 = vrot.slane %v1740_v62, 4 }
 0x39f   : > { %v1652_v34 = vpop.f32.mrf.mxu0 }
 0x3a0   : > { %v1612_v42 = vpop.f32.mrf.mxu2  ;;  %v1631_v54 = vpop.f32.mrf.mxu3 }
 0x3a1   : > { %v1698_v48 = vsel %vm528_vm1, %v1697_v63, %v1612_v42  ;;  %v1699_v26 = vrot.slane %v1612_v42, 4  ;;  %v1711_v29 = vrot.slane %v1631_v54, 4 }
 0x3a2   : > { %v1704_v36 = vperm.slane %v1698_v48, %v2862_v32  ;;  %v1669_v20 = vpop.f32.mrf.mxu1 }
 0x3a3   : > { %v1700_v12 = vsel %vm528_vm1, %v1650_v27, %v1699_v26  ;;  %v1709_v22 = vrot.slane %v1669_v20, 4  ;;  %v1712_v37 = vsel %vm528_vm1, %v1669_v20, %v1711_v29 }
 0x3a4   : > { %v1708_v39 = vperm.slane %v1700_v12, %v2862_v32  ;;  %v1720_v44 = vperm.slane %v1712_v37, %v2862_v32  ;;  %v1747_v43 = vrot.slane %v1704_v36, 4 }
 0x3a5   : > { %v1710_v45 = vsel %vm528_vm1, %v1709_v22, %v1631_v54 }
 0x3a6   : > { %v1759_v25 = vrot.slane %v1708_v39, 4  ;;  %v1716_v31 = vperm.slane %v1710_v45, %v2862_v32  ;;  %v1757_v15 = vrot.slane %v1720_v44, 4 }
 0x3a8   : > { %v1745_v52 = vrot.slane %v1716_v31, 4  ;;  %v1748_v58 = vsel %vm528_vm1, %v1716_v31, %v1747_v43  ;;  %v1758_v59 = vsel %vm528_vm1, %v1757_v15, %v1708_v39  ;;  %v1760_v60 = vsel %vm528_vm1, %v1720_v44, %v1759_v25  ;;  %v1614_v61 = vpop.f32.mrf.mxu2  ;;  %v1633_v8 = vpop.f32.mrf.mxu3 }
 0x3a9   : > { %v1756_v2 = vperm.slane %v1748_v58, %v2871_v41  ;;  %v1764_v0 = vperm.slane %v1758_v59, %v2871_v41  ;;  %v1768_v23 = vperm.slane %v1760_v60, %v2871_v41 }
 0x3aa   : > { %v1746_v33 = vsel %vm528_vm1, %v1745_v52, %v1704_v36  ;;  %v1671_v57 = vpop.f32.mrf.mxu1 }
 0x3ab   : > { %v1752_v5 = vperm.slane %v1746_v33, %v2871_v41  ;;  %v1773_v51 = vrot.slane %v1756_v2, 4  ;;  %v1776_v9 = vsel %vm528_vm1, %v1756_v2, %v1775_v1  ;;  %v1777_v24 = vrot.slane %v1764_v0, 4 }
 0x3ac   : > { %v1780_v47 = vsel %vm528_vm1, %v1764_v0, %v1779_v49  ;;  %v1781_v3 = vrot.slane %v1768_v23, 4  ;;  %v1784_v55 = vsel %vm528_vm1, %v1768_v23, %v1783_v4  ;;  %v1797_v11 = vrot.slane %v1776_v9, 4 }
 0x3ad   : > { %v1769_v27 = vrot.slane %v1752_v5, 4  ;;  %v1774_v10 = vsel %vm528_vm1, %v1773_v51, %v1732_v18  ;;  %v1821_v17 = vrot.slane %v1784_v55, 4  ;;  %v1823_v16 = vrot.slane %v1780_v47, 4 }
 0x3ae   : > { %v1782_v14 = vsel %vm528_vm1, %v1781_v3, %v1744_v28  ;;  %v1772_v53 = vsel %vm528_vm1, %v1752_v5, %v1771_v21  ;;  %v1778_v40 = vsel %vm528_vm1, %v1777_v24, %v1740_v62  ;;  %v1785_v13 = vrot.slane %v1774_v10, 4 }
 0x3af   : > { %v1809_v38 = vrot.slane %v1782_v14, 4  ;;  %v1824_v19 = vsel %vm528_vm1, %v1784_v55, %v1823_v16  ;;  %v1770_v6 = vsel %vm528_vm1, %v1769_v27, %v1728_v46  ;;  %v1798_v63 = vsel %vm528_vm1, %v1797_v11, %v1772_v53 }
 0x3b0   : > { %v1786_v34 = vsel %vm528_vm1, %v1785_v13, %v1770_v6  ;;  %v1804_v50 = vperm.slane %v1798_v63, %v2862_v32  ;;  %v1811_v42 = vrot.slane %v1778_v40, 4  ;;  %v1822_v54 = vsel %vm528_vm1, %v1821_v17, %v1780_v47 }
 0x3b1   : > { %v1792_v7 = vperm.slane %v1786_v34, %v2862_v32  ;;  %v1810_v48 = vsel %vm528_vm1, %v1809_v38, %v1778_v40  ;;  %v1828_v26 = vperm.slane %v1822_v54, %v2862_v32  ;;  %v1787_v29 = vrot.slane %v1770_v6, 4  ;;  %v2192_v40 = vld [vmem:[#allocation10] sm:$0xff] }
 0x3b2   : > { %v1816_v30 = vperm.slane %v1810_v48, %v2862_v32  ;;  %v1833_v35 = vrot.slane %v1804_v50, 4  ;;  %v1799_v56 = vrot.slane %v1772_v53, 4  ;;  %v1812_v36 = vsel %vm528_vm1, %v1782_v14, %v1811_v42 }
 0x3b3   : > { %v1857_v20 = vrot.slane %v1828_v26, 4  ;;  %v1835_v12 = vrot.slane %v1792_v7, 4  ;;  %v1788_v22 = vsel %vm528_vm1, %v1774_v10, %v1787_v29  ;;  %v1820_v37 = vperm.slane %v1812_v36, %v2862_v32 }
 0x3b4   : > { %v1834_v18 = vsel %vm528_vm1, %v1833_v35, %v1792_v7  ;;  %v1859_v39 = vrot.slane %v1816_v30, 4  ;;  %v1796_v44 = vperm.slane %v1788_v22, %v2862_v32  ;;  %v1800_v46 = vsel %vm528_vm1, %v1776_v9, %v1799_v56  ;;  %v2353_v56 = vld [vmem:[%s3450_s7] ss:$0 sm:$0xff] }
 0x3b5   : > { %v1840_v62 = vperm.slane %v1834_v18, %v2871_v41  ;;  %v1858_v28 = vsel %vm528_vm1, %v1857_v20, %v1816_v30  ;;  %v1836_v45 = vsel %vm528_vm1, %v1804_v50, %v1835_v12  ;;  %v1808_v43 = vperm.slane %v1800_v46, %v2862_v32 }
 0x3b6   : > { %v1864_v25 = vperm.slane %v1858_v28, %v2871_v41  ;;  %v1844_v31 = vperm.slane %v1836_v45, %v2871_v41  ;;  %v1860_v15 = vsel %vm528_vm1, %v1828_v26, %v1859_v39  ;;  %v1832_v52 = vperm.slane %v1824_v19, %v2862_v32 }
 0x3b7   : > { %v1883_v58 = vrot.slane %v1840_v62, 4  ;;  %v1868_v59 = vperm.slane %v1860_v15, %v2871_v41  ;;  %v1845_v60 = vrot.slane %v1808_v43, 4  ;;  %v1847_v61 = vrot.slane %v1796_v44, 4 }
 0x3b8   : > { %v1887_v8 = vrot.slane %v1844_v31, 4  ;;  %v1869_v1 = vrot.slane %v1832_v52, 4  ;;  %v1871_v2 = vrot.slane %v1820_v37, 4  ;;  %v1881_v9 = vrot.slane %v1864_v25, 4 }
 0x3b9   : > { %v1884_v0 = vsel %vm528_vm1, %v1864_v25, %v1883_v58  ;;  %v1885_v23 = vrot.slane %v1868_v59, 4  ;;  %v1846_v21 = vsel %vm528_vm1, %v1845_v60, %v1796_v44  ;;  %v1848_v49 = vsel %vm528_vm1, %v1808_v43, %v1847_v61 }
 0x3ba   : > { %1898 = vrot.lane.b32.xlu0 %v1884_v0, %s2647_s20  ;;  %v1888_v4 = vsel %vm528_vm1, %v1868_v59, %v1887_v8  ;;  %v1870_v32 = vsel %vm528_vm1, %v1869_v1, %v1820_v37  ;;  %v1856_v33 = vperm.slane %v1848_v49, %v2871_v41  ;;  %v1852_v5 = vperm.slane %v1846_v21, %v2871_v41 }
 0x3bb   : > { %1906 = vrot.lane.b32.xlu1 %v1888_v4, %s2648_s16  ;;  %v1886_v57 = vsel %vm528_vm1, %v1885_v23, %v1844_v31  ;;  %v1876_v51 = vperm.slane %v1870_v32, %v2871_v41  ;;  %v1872_v47 = vsel %vm528_vm1, %v1832_v52, %v1871_v2  ;;  %v1882_v27 = vsel %vm528_vm1, %v1881_v9, %v1840_v62  ;;  %s2556_s16 = scalar_lea.hbm %s3451_s8, 16 }
 0x3bc   : > { %1902 = vrot.lane.b32.xlu2 %v1886_v57, %s2649_s6  ;;  %v1895_v3 = vrot.slane %v1856_v33, 4  ;;  %v1891_v55 = vrot.slane %v1852_v5, 4  ;;  %v1880_v11 = vperm.slane %v1872_v47, %v2871_v41  ;;  %v2193_v41 = vld [vmem:[#allocation10 + $0x8] sm:$0xff]  ;;  %p2558_p11 = scmp.lt.s32.totalorder %s2556_s16, %s2552_s22 }
 0x3bd   : > { %v1889_v24 = vrot.slane %v1876_v51, 4  ;;  %1967 = vmatpush.bf16.msra.mxu2 %v2193_v41 }
 0x3be   : > { %v1896_v17 = vsel %vm528_vm1, %v1880_v11, %v1895_v3  ;;  %v1892_v16 = vsel %vm528_vm1, %v1876_v51, %v1891_v55  ;;  %v1893_v14 = vrot.slane %v1880_v11, 4  ;;  %p2559_p12 = por %p2558_p11, %p2557_p10 }
 0x3bf   : > { %v1890_v10 = vsel %vm528_vm1, %v1889_v24, %v1852_v5 }
 0x3c0   : > { %v1894_v53 = vsel %vm528_vm1, %v1893_v14, %v1856_v33  ;;  %p2560_p13 = pnand %p2559_p12, %p2555_p9 }
 0x3c1   : > { %1968 = vmatpush.bf16.msra.mxu2 %v2192_v40 }
 0x3c2   : > { %1910 = vrot.lane.b32.xlu0 %v1890_v10, %s2650_s13 }
 0x3c3   : > { %1922 = vrot.lane.b32.xlu1 %v1896_v17, %s2651_s26 }
 0x3c4   : > { %1914 = vrot.lane.b32.xlu2 %v1892_v16, %s2652_s2 }
 0x3ca   : > { %1918 = vrot.lane.b32.xlu0 %v1894_v53, %s2653_s4 }
 0x416   : > { %v1903_v38 = vpop.permute.xlu2 %1902 }
 0x41e   : > { %v1915_v54 = vpop.permute.xlu2 %1914 }
 0x42c   : > { %v1899_v13 = vpop.permute.xlu0 %1898 }
 0x42d   : > { %v1925_v19 = vsel %vm1270_vm2, %v1882_v27, %v1899_v13  ;;  %v1907_v6 = vpop.permute.xlu1 %1906 }
 0x42e   : > { %v1926_v34 = vsel %vm1423_vm3, %v1925_v19, %v1903_v38 }
 0x42f   : > { %v1928_v50 = vsel %vm1927_vm5, %v1926_v34, %v1907_v6 }
 0x434   : > { %v1911_v63 = vpop.permute.xlu0 %1910 }
 0x435   : > { %v1930_v42 = vsel %vm1929_vm6, %v1928_v50, %v1911_v63  ;;  %v1923_v26 = vpop.permute.xlu1 %1922 }
 0x436   : > { %v1932_v48 = vsel %vm1931_vm7, %v1930_v42, %v1915_v54 }
 0x43c   : > { %v1919_v7 = vpop.permute.xlu0 %1918 }
 0x43d   : > { %v1934_v29 = vsel %vm1933_vm8, %v1932_v48, %v1919_v7 }
 0x43e   : > { %v1936_v30 = vsel %vm1935_vm9, %v1934_v29, %v1923_v26 }
 0x43f   : > { %v1937_v35 = vpack.c.bf16 %v1936_v30, %v1936_v30 }
 0x441   : > { %2183 = vmatmul.msk.bf16.vlgmr.msra.gmra.mxu2 %vm451_vm0, %v1937_v35 }
 0x4c4   : > { %v1970_v36 = vpop.f32.mrf.mxu2 }
 0x4c5   : > { %v1971_v20 = vadd.f32 %v2353_v56, %v1970_v36 }
 0x4c7   : > { %1974 = vst.msk [vmem:[%s427_s24] sm:$0xff] %vm451_vm0, %v1971_v20 }
 0x4c8   : > { %2563 = shalt.err (!%p2560_p13)
}
 0x4c9   : > { %2210 = dma.vmem_to_hbm [thread:$0]  (%p2786_p4), %s1990_s25, 128, %s1992_s12, %s1976_s30  }
 0x4cc   : > { %v1972_v12 = vpop.f32.mrf.mxu2 }
 0x4cd PF: > { %s3475_s21 = sld [smem:[#allocation17_spill]]  ;;  %p2230_p0 = pnand %p2129_p6, %p2794_p7 }
 0x4cf   : > { %p2231_p2 = pneg %p2230_p0 }
 0x4d3   : > { %s2003_s2 = sand.u32 1, %s3475_s21  }
 0x4d4   : > { %s2004_s4 = scalar_lea.sflag [#allocation4], %s2003_s2 }
 0x4d5   : > { %2605 = dma.done.wait (%p2231_p2), %s2004_s4, 128  }
 0x4d6   : > { %2607 = vsyncadd (%p2231_p2), %s2004_s4, 4294967168  ;;  %s28_s10 = sadd.s32 1, %s2630_s10   ;;  %s3477_s29 = sld [smem:[#allocation18_spill]] }
 0x4d7   : > { %p25_p5 = scmp.ge.s32.totalorder %s28_s10, 4   ;;  %s3478_s23 = sld [smem:[#allocation21_spill]] }
 0x4d8   : > { %s3479_s30 = sld [smem:[#allocation19_spill]]  ;;  %s3481_s27 = smov %s2614_s28 }
 0x4d9   : > { %s3480_s9 = sld [smem:[#allocation20_spill]]  ;;  %27 = sbr.rel (!%p25_p5) target bundleno = 13 (0xd), region = 122 }
 0x4dc   : > { %s3482_s28 = smov %s3477_s29 }
 0x4dd   : > { %s3483_s29 = smov %s3478_s23 }
 0x4de   :  { %2010 = vsyncpa [#allocation3], 1 }
 0x4df   :  { %2012 = vsyncpa [#allocation3 + $0x1], 1 }
 0x4e0   :  { %2013 = vsyncpa [#allocation6], 1 }
 0x4e1   :  { %2015 = vsyncpa [#allocation6 + $0x1], 1 }
 0x4e2   :  { %2016 = vsyncpa [#allocation9], 1 }
 0x4e3   :  { %2017 = vsyncpa [#allocation4], 1 }
 0x4e4   :  { %2019 = vsyncpa [#allocation4 + $0x1], 1 }

// kernel: tpu_custom_call.1
= control target key start
LH: loop header
LB: loop body
LE: loop exit
PB: predicated region body
PF: predicated region fallthrough
CT: control target
= control target key end

     0   :  { %s2020_s0 = inlined_call_operand.hbm [shape: bf16[2,8,32], index: 0, kind: input, shape index: {}]   ;;  %s2021_s1 = inlined_call_operand.hbm [shape: bf16[2,8,32], index: 1, kind: input, shape index: {}]   ;;  %s2022_s2 = inlined_call_operand.hbm [shape: bf16[32,32], index: 2, kind: input, shape index: {}]   ;;  %s2023_s3 = inlined_call_operand.vmem [shape: f32[1,32], index: 3, kind: input, shape index: {}]   ;;  %s2024_s4 = inlined_call_operand.hbm [shape: bf16[32,64], index: 4, kind: input, shape index: {}]   ;;  %s2025_s5 = inlined_call_operand.vmem [shape: f32[1,64], index: 5, kind: input, shape index: {}]   ;;  %s2026_s6 = inlined_call_operand.hbm [shape: bf16[32,32], index: 6, kind: input, shape index: {}]   ;;  %s2027_s7 = inlined_call_operand.vmem [shape: f32[1,32], index: 7, kind: input, shape index: {}]   ;;  %s2028_s8 = inlined_call_operand.hbm [shape: f32[2,8,32], index: 8, kind: output, shape index: {}]  }
   0x1   :  { %2034 = sst [smem:[#allocation23_spill]] %s2022_s2 }
   0x2   :  { %2035 = sst [smem:[#allocation24_spill]] %s2024_s4 }
   0x3   :  { %2036 = sst [smem:[#allocation25_spill]] %s2026_s6 }
   0x4   :  { %13 = vsyncpa [#allocation3], 0 }
   0x5   :  { %15 = vsyncpa [#allocation3 + $0x1], 0 }
   0x6   :  { %16 = vsyncpa [#allocation6], 0 }
   0x7   :  { %18 = vsyncpa [#allocation6 + $0x1], 0 }
   0x8   :  { %19 = vsyncpa [#allocation9], 0 }
   0x9   :  { %20 = vsyncpa [#allocation4], 0 }
   0xa   :  { %22 = vsyncpa [#allocation4 + $0x1], 0  ;;  %s1728_s27 = smov 0   ;;  %s1730_s28 = smov 0  }
   0xb   :  { %s1732_s29 = smov 0   ;;  %s1734_s30 = smov 0  }
   0xc   :  { %s1736_s9 = smov 0   ;;  %s1738_s10 = smov 0  }
   0xd LB: > { %2037 = sst [smem:[#allocation17_spill]] %s1634_s27  ;;  %s1759_s11 = sadd.s32 4294967295, %s1654_s10   ;;  %s1654_s10 = sphi %s1738_s10, %s28_s10   ;;  %s1650_s9 = sphi %s1736_s9, %s2057_s9   ;;  %s1646_s30 = sphi %s1734_s30, %s2056_s30   ;;  %s1642_s29 = sphi %s1732_s29, %s2055_s29   ;;  %s1638_s28 = sphi %s1730_s28, %s2059_s28   ;;  %s1634_s27 = sphi %s1728_s27, %s2058_s27  }
   0xe   : > { %2038 = sst [smem:[#allocation18_spill]] %s1642_s29  ;;  %p1184_p0 = scmp.ge.s32.totalorder %s1654_s10, 1 }
   0xf   : > { %2039 = sst [smem:[#allocation19_spill]] %s1650_s9  ;;  %p63_p1 = scmp.eq.s32.totalorder %s1759_s11, 0 }
  0x10   : > { %p253_p2 = scmp.lt.s32.totalorder %s1654_s10, 3  ;;  %s2040_s2 = sld [smem:[#allocation23_spill]] }
  0x11   : > { %s1656_s16 = smov [#allocation7]   ;;  %p1188_p6 = scmp.ge.s32.totalorder %s1654_s10, 2 }
  0x12   : > { %p1767_p3 = pnand %p1184_p0, %p253_p2  ;;  %s266_s17 = sshll.u32 %s1656_s16, 4  ;;  %s267_s17 = int_to_ptr.vmem [resolvable:$true] %s266_s17 }
  0x13   : > { %s2043_s4 = sld [smem:[#allocation24_spill]]  ;;  %s1657_s22 = smov 64  }
  0x14   : > { %p1271_p4 = pneg %p1767_p3  ;;  %s1658_s23 = smov 4  }
  0x15   : > { %s1659_s24 = smov [#allocation8]   ;;  %s2044_s6 = sld [smem:[#allocation25_spill]] }
  0x16   : > { %s264_s14 = sshll.u32 %s2040_s2, 4  ;;  %p1775_p5 = pnand %p1271_p4, %p63_p1  ;;  %s265_s14 = int_to_ptr.hbm [resolvable:$true] %s264_s14 }
  0x17   : > { %s283_s25 = sshll.u32 %s1659_s24, 4  ;;  %s1660_s16 = smov [#allocation10]   ;;  %s284_s25 = int_to_ptr.vmem [resolvable:$true] %s283_s25 }
  0x18   : > { %1274 = dma.hbm_to_vmem [thread:$0]  (!%p1775_p5), %s265_s14, 256, %s267_s17, [#allocation6], %s1657_s22, %s1657_s22, %s1658_s23  }
  0x19   : > { %s281_s21 = sshll.u32 %s2043_s4, 4  ;;  %s300_s19 = sshll.u32 %s1660_s16, 4  ;;  %s282_s21 = int_to_ptr.hbm [resolvable:$true] %s281_s21  ;;  %s301_s19 = int_to_ptr.vmem [resolvable:$true] %s300_s19 }
  0x1a   : > { %1277 = dma.hbm_to_vmem [thread:$0]  (!%p1775_p5), %s282_s21, 256, %s284_s25, [#allocation9], %s1657_s22, %s1657_s22, %s1658_s23  }
  0x1b   : > { %s298_s13 = sshll.u32 %s2044_s6, 4  ;;  %s1183_s14 = sadd.s32 4294967294, %s1654_s10   ;;  %s299_s13 = int_to_ptr.hbm [resolvable:$true] %s298_s13 }
  0x1c   : > { %1280 = dma.hbm_to_vmem [thread:$0]  (!%p1775_p5), %s299_s13, 256, %s301_s19, [#allocation9], %s1657_s22, %s1657_s22, %s1658_s23  }
  0x1d   : > { %s40_s17 = sadd.s32 1, %s1650_s9  ;;  %s49_s20 = sadd.s32 1, %s1642_s29 }
  0x1e   : > { %p42_p7 = scmp.ge.s32.totalorder %s40_s17, 2  ;;  %p56_p8 = scmp.ne.s32.totalorder %s1642_s29, %s1638_s28 }
  0x1f   : > { %p57_p9 = scmp.eq.s32.totalorder %s1654_s10, 0  ;;  %p62_p10 = scmp.ne.s32.totalorder %s1638_s28, %s1634_s27 }
  0x20   : > { %s2061_s17 = smov (%p42_p7, %s40_s17), 0  ;;  %p240_p13 = scmp.eq.s32.totalorder %s1759_s11, 1 }
  0x21   : > { %2045 = sst [smem:[#allocation20_spill]] %s2061_s17  ;;  %p1802_p11 = por %p57_p9, %p56_p8 }
  0x22   : > { %p1808_p12 = por %p63_p1, %p62_p10  ;;  %s44_s22 = ssub.s32 %s1650_s9, %s2061_s17 }
  0x23   : > { %p47_p0 = scmp.eq.s32.totalorder %s44_s22, 0  ;;  %p246_p2 = scmp.eq.s32.totalorder %s1183_s14, 1 }
  0x24   : > { %p1815_p4 = por %p240_p13, %p56_p8  ;;  %p1295_p5 = scmp.lt.s32.totalorder %s1654_s10, 2 }
  0x25   : > { %s1821_s24 = scalar_select %p47_p0, %s1642_s29, %s49_s20  }
  0x26   : > { %p1823_p7 = por %p246_p2, %p62_p10  ;;  %s317_s26 = sand.u32 1, %s1642_s29  }
  0x27   : > { %2049 = sst [smem:[#allocation21_spill]] %s1821_s24  ;;  %s1189_s12 = sshll.u32 %s317_s26, 2 }
  0x28   : > { %s2050_s25 = scalar_select %p1823_p7, 1, 0 }
  0x29   : > { %s1190_s13 = sshll.u32 %s1650_s9, 2  ;;  %s321_s14 = scalar_lea.vmem [#allocation2], %s1189_s12 }
  0x2a   : > { %2051 = sst [smem:[#allocation22_spill]] %s2050_s25  ;;  %s326_s22 = scalar_lea.hbm %s2020_s0, %s1190_s13 }
  0x2b   : > { %s330_s2 = sshll.u32 %s321_s14, 4  ;;  %s328_s4 = sshll.u32 %s326_s22, 4  ;;  %s331_s2 = int_to_ptr.vmem [resolvable:$true] %s330_s2  ;;  %s329_s4 = int_to_ptr.hbm [resolvable:$true] %s328_s4 }
  0x2c   : > { %p1282_p8 = pnand %p1295_p5, %p1802_p11  ;;  %s345_s17 = scalar_lea.hbm %s2021_s1, %s1190_s13 }
  0x2d   : > { %s337_s24 = sand.u32 1, %s1654_s10   ;;  %s318_s25 = scalar_lea.sflag [#allocation3], %s317_s26 }
  0x2e   : > { %1284 = dma.hbm_to_vmem [thread:$0]  (!%p1282_p8), %s329_s4, 64, %s331_s2, %s318_s25  }
  0x2f   : > { %s347_s29 = sshll.u32 %s345_s17, 4  ;;  %s341_s9 = scalar_lea.vmem [#allocation5], %s1189_s12  ;;  %s348_s29 = int_to_ptr.hbm [resolvable:$true] %s347_s29 }
  0x30   : > { %s349_s27 = sshll.u32 %s341_s9, 4  ;;  %s338_s16 = scalar_lea.sflag [#allocation6], %s337_s24  ;;  %s350_s27 = int_to_ptr.vmem [resolvable:$true] %s349_s27 }
  0x31   : > { %1287 = dma.hbm_to_vmem [thread:$0]  (!%p1282_p8), %s348_s29, 64, %s350_s27, %s338_s16  }
  0x32   : > { %358 = sbr.rel (%p1767_p3) target bundleno = 1445 (0x5a5), region = 52  ;;  %s1841_s21 = sand.u32 (!%p1767_p3), 1, %s1638_s28  }
  0x33   : > { %s1194_s6 = sshll.u32 (!%p1767_p3), %s1841_s21, 2  ;;  %s361_s13 = scalar_lea.sflag (!%p1767_p3), [#allocation3], %s1841_s21 }
  0x34   : > { %s364_s26 = scalar_lea.vmem (!%p1767_p3), [#allocation2], %s1194_s6 }
  0x37   : > { %1613 = dma.done.wait (%p1808_p12), %s361_s13, 64  }
  0x38   : > { %1615 = vsyncadd (%p1808_p12), %s361_s13, 4294967232  ;;  %s370_s2 = sand.u32 1, %s1759_s11   ;;  %s374_s27 = scalar_lea.vmem [#allocation5], %s1194_s6 }
  0x39   : > { %s371_s4 = scalar_lea.sflag [#allocation6], %s370_s2 }
  0x3a   : > { %1617 = dma.done.wait (%p1808_p12), %s371_s4, 64  }
  0x3b   : > { %1619 = vsyncadd (%p1808_p12), %s371_s4, 4294967232 }
  0x3c   : > { %1621 = dma.done.wait (%p63_p1), [#allocation6], 256  }
  0x3d   : > { %1623 = vsyncadd (%p63_p1), [#allocation6], 4294967040 }
  0x3e   : > { %1625 = dma.done.wait (%p63_p1), [#allocation9], 512  }
  0x3f   : > { %1627 = vsyncadd (%p63_p1), [#allocation9], 4294966784  ;;  %v1248_v0 = vld [vmem:[#allocation7 + $0x8] sm:$0xff]  ;;  %v1250_v1 = vld [vmem:[#allocation8 + $0x8] sm:$0xff]  ;;  %vm451_vm0 = vcmask 261120   ;;  %vm507_vm1 = vcmask 31744  }
  0x40   : > { %v1247_v2 = vld [vmem:[#allocation7] sm:$0xff]  ;;  %461 = vmatpush.bf16.msra.mxu0 %v1248_v0  ;;  %498 = vmatpush.bf16.msra.mxu1 %v1250_v1  ;;  %v1249_v3 = vld [vmem:[#allocation8] sm:$0xff]  ;;  %v430_v5 = vld [vmem:[%s374_s27] sm:$0xf]  ;;  %s1661_s17 = smov 96   ;;  %s1662_s18 = smov 124  }
  0x41   : > { %v429_v4 = vld [vmem:[%s364_s26] sm:$0xf]  ;;  %s1663_s24 = smov 120   ;;  %s1664_s25 = smov 116   ;;  %vm546_vm2 = vcmask 1043456   ;;  %vm527_vm3 = vcmask 64512  }
  0x42   : > { %v1375_v6 = vld [vmem:[%s2023_s3] ss:$0 sm:$0xff]  ;;  %s1665_s12 = smov 112   ;;  %s1666_s19 = smov 108   ;;  %vm986_vm4 = vcmask 97280   ;;  %vm988_vm5 = vcmask 130048  }
  0x43   : > { %v1376_v7 = vld [vmem:[%s2025_s5] ss:$0 sm:$0xff]  ;;  %s1667_s22 = smov 100   ;;  %s1668_s14 = smov 104   ;;  %vm990_vm6 = vcmask 162816   ;;  %vm992_vm7 = vcmask 195584  }
  0x44   : > { %462 = vmatpush.bf16.msra.mxu0 %v1247_v2  ;;  %499 = vmatpush.bf16.msra.mxu1 %v1249_v3  ;;  %s1669_s20 = smov 92   ;;  %s1670_s16 = smov 84   ;;  %vm994_vm8 = vcmask 228352  }
  0x45   : > { %s1671_s6 = smov 80   ;;  %s1672_s13 = smov 88  }
  0x46   : > { %s1673_s26 = smov 76   ;;  %s1674_s2 = smov 68  }
  0x47   : > { %1208 = vmatmul.msk.bf16.vlgmr.msra.gmra.mxu0 %vm451_vm0, %v429_v4  ;;  %1217 = vmatmul.msk.bf16.vlgmr.msra.gmra.mxu1 %vm451_vm0, %v430_v5  ;;  %s1675_s4 = smov 72   ;;  %s1676_s27 = smov 8  }
  0x48   : > { %s1677_s29 = smov 16   ;;  %s1678_s9 = smov 4  }
  0x49   : > { %s1679_s11 = smov 12   ;;  %s1680_s15 = smov 20  }
  0xc4   : > { %v464_v8 = vpop.f32.mrf.mxu0  ;;  %v501_v9 = vpop.f32.mrf.mxu1 }
  0xc5   : > { %v465_v10 = vadd.f32 %v1375_v6, %v464_v8  ;;  %v502_v11 = vadd.f32 %v1376_v7, %v501_v9 }
  0xc7   : > { %v468_v12 = vmul.f32 0.5, %v465_v10  ;;  %v1870_v13 = vpack.c.bf16 %v502_v11, %v502_v11 }
  0xc9   : > { %v1872_v14 = vpack.c.bf16 %v468_v12, %v468_v12  ;;  %541 = vrot.lane.b32.xlu1 %v1870_v13, %s1661_s17  ;;  %v512_v15 = vsel %vm507_vm1, %v1870_v13, 0  ;;  %s1681_s17 = smov 28  }
  0xca   : > { %521 = vmatpush.bf16.xpose.msra.mxu2 %v512_v15 }
  0xcb   : > { %564 = vrot.lane.b32.xlu2 %v1872_v14, %s1662_s18 }
  0xcc   : > { %v466_v16 = vpop.f32.mrf.mxu0  ;;  %v503_v17 = vpop.f32.mrf.mxu1 }
  0xd1   : > { %566 = vrot.lane.b32.xlu1 %v1870_v13, %s1662_s18  ;;  %1218 = vmatmul.msk.bf16.vlgmr.msra.gmra.mxu2 %vm507_vm1, %v1872_v14  ;;  %s1682_s18 = smov 24  }
  0xd3   : > { %622 = vrot.lane.b32.xlu2 %v1870_v13, %s1663_s24 }
  0xd9   : > { %620 = vrot.lane.b32.xlu1 %v1872_v14, %s1663_s24  ;;  %s1244_s24 = sshll.u32 %s1646_s30, 3  ;;  %s1035_s30 = scalar_lea.sflag [#allocation4], %s1841_s21 }
  0xdb   : > { %676 = vrot.lane.b32.xlu2 %v1872_v14, %s1664_s25 }
  0xe1   : > { %734 = vrot.lane.b32.xlu1 %v1870_v13, %s1665_s12 }
  0xe3   : > { %790 = vrot.lane.b32.xlu2 %v1870_v13, %s1666_s19 }
  0xe9   : > { %732 = vrot.lane.b32.xlu1 %v1872_v14, %s1665_s12 }
  0xeb   : > { %788 = vrot.lane.b32.xlu2 %v1872_v14, %s1666_s19 }
  0xf1   : > { %902 = vrot.lane.b32.xlu1 %v1870_v13, %s1667_s22 }
  0xf3   : > { %844 = vrot.lane.b32.xlu2 %v1872_v14, %s1668_s14 }
 0x125   : > { %v1893_v18 = vpop.permute.xlu2 %564 }
 0x12d   : > { %v623_v19 = vpop.permute.xlu2 %622 }
 0x12e   : > { %v628_v20 = vsel %vm507_vm1, %v623_v19, 0 }
 0x12f   : > { %637 = vmatpush.bf16.xpose.msrb.mxu1 %v628_v20 }
 0x135   : > { %v677_v43 = vpop.permute.xlu2 %676 }
 0x13b   : > { %v542_v21 = vpop.permute.xlu1 %541 }
 0x13c   : > { %v548_v22 = vsel %vm546_vm2, %v542_v21, 0 }
 0x13d   : > { %557 = vmatpush.bf16.msra.mxu3 %v548_v22  ;;  %v791_v44 = vpop.permute.xlu2 %790 }
 0x13e   : > { %v796_v59 = vsel %vm507_vm1, %v791_v44, 0 }
 0x143   : > { %v567_v23 = vpop.permute.xlu1 %566 }
 0x144   : > { %v572_v24 = vsel %vm507_vm1, %v567_v23, 0 }
 0x145   : > { %581 = vmatpush.bf16.xpose.msrb.mxu3 %v572_v24  ;;  %v789_v45 = vpop.permute.xlu2 %788 }
 0x14b   : > { %v621_v25 = vpop.permute.xlu1 %620 }
 0x14c   : > { %1222 = vmatmul.msk.bf16.vlgmr.msrb.gmra.mxu1 %vm507_vm1, %v621_v25 }
 0x14d   : > { %v845_v46 = vpop.permute.xlu2 %844 }
 0x153   : > { %v735_v26 = vpop.permute.xlu1 %734 }
 0x154   : > { %v740_v27 = vsel %vm507_vm1, %v735_v26, 0  ;;  %v523_v28 = vpop.f32.mrf.mxu2 }
 0x155   : > { %749 = vmatpush.bf16.xpose.msra.mxu1 %v740_v27  ;;  %v528_v29 = vsel %vm527_vm3, %v523_v28, -inf }
 0x156   : > { %529 = vmax.xlane.f32.xlu0 %v528_v29 }
 0x15b   : > { %v733_v30 = vpop.permute.xlu1 %732 }
 0x15c   : > { %v525_v31 = vpop.f32.mrf.mxu2  ;;  %1226 = vmatmul.msk.bf16.vlgmr.msra.gmra.mxu1 %vm507_vm1, %v733_v30 }
 0x163   : > { %v903_v61 = vpop.permute.xlu1 %902 }
 0x164   : > { %v908_v62 = vsel %vm507_vm1, %v903_v61, 0 }
 0x1c9   : > { %v639_v32 = vpop.f32.mrf.mxu1  ;;  %v530_v33 = vpop.xlane.xlu0 %529 }
 0x1ca   : > { %v531_v34 = vsub.f32 %v523_v28, %v530_v33  ;;  %v643_v35 = vsel %vm527_vm3, %v639_v32, -inf }
 0x1cb   : > { %644 = vmax.xlane.f32.xlu2 %v643_v35 }
 0x1cc   : > { %v532_v36 = vmul.f32 1.442695, %v531_v34 }
 0x1ce   : > { %1378 = vpow2.f32 %v532_v36 }
 0x1d1   : > { %v641_v37 = vpop.f32.mrf.mxu1 }
 0x1d4   : > { %v1379_v38 = vpop.eup %1378 }
 0x1d5   : > { %v534_v39 = vsel %vm527_vm3, %v1379_v38, 0.0 }
 0x1d6   : > { %535 = vadd.xlane.f32.xlu0 %v534_v39 }
 0x1d9   : > { %v1904_v40 = vpop.f32.mrf.mxu1 }
 0x1da   : > { %v755_v41 = vsel %vm527_vm3, %v1904_v40, -inf }
 0x1db   : > { %756 = vmax.xlane.f32.xlu2 %v755_v41 }
 0x1e1   : > { %v753_v42 = vpop.f32.mrf.mxu1 }
 0x1ea   : > { %678 = vrot.lane.b32.xlu0 %v1870_v13, %s1664_s25  ;;  %s1199_s25 = sshll.u32 %s1841_s21, 3 }
 0x1f2   : > { %846 = vrot.lane.b32.xlu0 %v1870_v13, %s1668_s14 }
 0x1fa   : > { %900 = vrot.lane.b32.xlu0 %v1872_v14, %s1667_s22  ;;  %s1046_s22 = scalar_lea.hbm %s2028_s8, %s1244_s24 }
 0x23e   : > { %v645_v47 = vpop.xlane.xlu2 %644 }
 0x23f   : > { %v646_v48 = vsub.f32 %v639_v32, %v645_v47 }
 0x241   : > { %v647_v49 = vmul.f32 1.442695, %v646_v48 }
 0x243   : > { %1380 = vpow2.f32 %v647_v49 }
 0x249   : > { %v1914_v50 = vpop.eup %1380  ;;  %v536_v51 = vpop.xlane.xlu0 %535 }
 0x24a   : > { %1382 = vrcp.f32 %v536_v51  ;;  %v649_v52 = vsel %vm527_vm3, %v1914_v50, 0.0 }
 0x24b   : > { %650 = vadd.xlane.f32.xlu2 %v649_v52 }
 0x250   : > { %v1383_v53 = vpop.eup %1382 }
 0x251   : > { %v538_v54 = vmul.f32 %v1383_v53, %v1379_v38 }
 0x253   : > { %v539_v55 = vpack.c.bf16 %v538_v54, %v538_v54 }
 0x255   : > { %1219 = vmatmul.msk.bf16.vlgmr.msra.gmra.mxu3 %vm527_vm3, %v539_v55 }
 0x25c   : > { %v679_v56 = vpop.permute.xlu0 %678 }
 0x25d   : > { %v684_v57 = vsel %vm507_vm1, %v679_v56, 0 }
 0x25e   : > { %693 = vmatpush.bf16.xpose.msra.mxu3 %v684_v57 }
 0x264   : > { %v847_v58 = vpop.permute.xlu0 %846 }
 0x265   : > { %v852_v60 = vsel %vm507_vm1, %v847_v58, 0  ;;  %1220 = vmatmul.msk.bf16.vlgmr.msrb.gmra.mxu3 %vm507_vm1, %v1893_v18  ;;  %v757_v18 = vpop.xlane.xlu2 %756 }
 0x266   : > { %805 = vmatpush.bf16.xpose.msrb.mxu3 %v796_v59  ;;  %861 = vmatpush.bf16.xpose.msrb.mxu1 %v852_v60  ;;  %v758_v19 = vsub.f32 %v1904_v40, %v757_v18 }
 0x268   : > { %v759_v20 = vmul.f32 1.442695, %v758_v19 }
 0x26a   : > { %1384 = vpow2.f32 %v759_v20 }
 0x26c   : > { %v901_v63 = vpop.permute.xlu0 %900 }
 0x26d   : > { %1230 = vmatmul.msk.bf16.vlgmr.msrb.gmra.mxu1 %vm507_vm1, %v845_v46 }
 0x270   : > { %v1385_v21 = vpop.eup %1384 }
 0x271   : > { %v761_v22 = vsel %vm527_vm3, %v1385_v21, 0.0 }
 0x275   : > { %1224 = vmatmul.msk.bf16.vlgmr.msra.gmra.mxu3 %vm507_vm1, %v677_v43 }
 0x276   : > { %917 = vmatpush.bf16.xpose.msra.mxu3 %v908_v62 }
 0x285   : > { %1228 = vmatmul.msk.bf16.vlgmr.msrb.gmra.mxu3 %vm507_vm1, %v789_v45 }
 0x295   : > { %1232 = vmatmul.msk.bf16.vlgmr.msra.gmra.mxu3 %vm507_vm1, %v901_v63 }
 0x2be   : > { %v651_v39 = vpop.xlane.xlu2 %650 }
 0x2d8   : > { %v1929_v0 = vpop.f32.mrf.mxu3 }
 0x2e0   : > { %v561_v1 = vpop.f32.mrf.mxu3 }
 0x2e8   : > { %v583_v2 = vpop.f32.mrf.mxu3 }
 0x2e9   : > { %v587_v3 = vsel %vm527_vm3, %v583_v2, -inf }
 0x2ea   : > { %588 = vmax.xlane.f32.xlu1 %v587_v3  ;;  %v1932_v4 = vpop.f32.mrf.mxu1 }
 0x2eb   : > { %v867_v5 = vsel %vm527_vm3, %v1932_v4, -inf }
 0x2ec   : > { %868 = vmax.xlane.f32.xlu0 %v867_v5 }
 0x2f0   : > { %v585_v6 = vpop.f32.mrf.mxu3 }
 0x2f2   : > { %v865_v7 = vpop.f32.mrf.mxu1 }
 0x2f8   : > { %v695_v8 = vpop.f32.mrf.mxu3 }
 0x2f9   : > { %v699_v9 = vsel %vm527_vm3, %v695_v8, -inf }
 0x2fa   : > { %700 = vmax.xlane.f32.xlu0 %v699_v9 }
 0x300   : > { %v697_v10 = vpop.f32.mrf.mxu3 }
 0x308   : > { %v807_v11 = vpop.f32.mrf.mxu3 }
 0x309   : > { %v811_v12 = vsel %vm527_vm3, %v807_v11, -inf }
 0x30a   : > { %812 = vmax.xlane.f32.xlu1 %v811_v12 }
 0x30e   : > { %599 = vrot.lane.b32.xlu0 %v1870_v13, %s1669_s20 }
 0x310   : > { %v809_v14 = vpop.f32.mrf.mxu3 }
 0x318   : > { %v919_v15 = vpop.f32.mrf.mxu3 }
 0x319   : > { %v923_v16 = vsel %vm527_vm3, %v919_v15, -inf }
 0x31a   : > { %924 = vmax.xlane.f32.xlu2 %v923_v16 }
 0x320   : > { %v921_v17 = vpop.f32.mrf.mxu3 }
 0x323   : > { %711 = vrot.lane.b32.xlu1 %v1870_v13, %s1670_s16  ;;  %s427_s16 = scalar_lea.vmem [#allocation11], %s1199_s25 }
 0x32b   : > { %767 = vrot.lane.b32.xlu1 %v1870_v13, %s1671_s6  ;;  %s1048_s6 = sshll.u32 %s427_s16, 4  ;;  %s1049_s6 = int_to_ptr.vmem [resolvable:$true] %s1048_s6 }
 0x332   : > { %655 = vrot.lane.b32.xlu2 %v1870_v13, %s1672_s13  ;;  %s1050_s13 = sshll.u32 %s1046_s22, 4  ;;  %s1051_s13 = int_to_ptr.hbm [resolvable:$true] %s1050_s13 }
 0x338   : > { %762 = vadd.xlane.f32.xlu0 %v761_v22 }
 0x35d   : > { %v589_v23 = vpop.xlane.xlu1 %588 }
 0x35e   : > { %v590_v24 = vsub.f32 %v583_v2, %v589_v23 }
 0x35f   : > { %v869_v26 = vpop.xlane.xlu0 %868 }
 0x360   : > { %v591_v25 = vmul.f32 1.442695, %v590_v24 }
 0x362   : > { %1386 = vpow2.f32 %v591_v25 }
 0x368   : > { %v1945_v27 = vpop.eup %1386 }
 0x369   : > { %v593_v28 = vsel %vm527_vm3, %v1945_v27, 0.0 }
 0x36a   : > { %594 = vadd.xlane.f32.xlu1 %v593_v28 }
 0x36d   : > { %v701_v29 = vpop.xlane.xlu0 %700 }
 0x36e   : > { %v702_v30 = vsub.f32 %v695_v8, %v701_v29 }
 0x370   : > { %v703_v31 = vmul.f32 1.442695, %v702_v30 }
 0x372   : > { %1388 = vpow2.f32 %v703_v31 }
 0x378   : > { %v1389_v32 = vpop.eup %1388 }
 0x379   : > { %v705_v33 = vsel %vm527_vm3, %v1389_v32, 0.0 }
 0x37a   : > { %706 = vadd.xlane.f32.xlu1 %v705_v33 }
 0x37d   : > { %v813_v34 = vpop.xlane.xlu1 %812 }
 0x37e   : > { %v814_v35 = vsub.f32 %v807_v11, %v813_v34 }
 0x380   : > { %v815_v36 = vmul.f32 1.442695, %v814_v35  ;;  %v600_v37 = vpop.permute.xlu0 %599 }
 0x381   : > { %v605_v38 = vsel %vm546_vm2, %v600_v37, 0 }
 0x382   : > { %1390 = vpow2.f32 %v815_v36  ;;  %614 = vmatpush.bf16.msrb.mxu0 %v605_v38 }
 0x383   : > { %1392 = vrcp.f32 %v651_v39 }
 0x388   : > { %v1391_v40 = vpop.eup %1390 }
 0x389   : > { %v817_v41 = vsel %vm527_vm3, %v1391_v40, 0.0  ;;  %v1393_v45 = vpop.eup %1392 }
 0x38a   : > { %818 = vadd.xlane.f32.xlu2 %v817_v41  ;;  %v653_v46 = vmul.f32 %v1393_v45, %v1914_v50  ;;  %v870_v50 = vsub.f32 %v1932_v4, %v869_v26  ;;  %v1252_v41 = vld [vmem:[#allocation10 + $0x8] sm:$0xff] }
 0x38b   : > { %1026 = vmatpush.bf16.msra.mxu1 %v1252_v41 }
 0x38c   : > { %v654_v53 = vpack.c.bf16 %v653_v46, %v653_v46  ;;  %v871_v58 = vmul.f32 1.442695, %v870_v50 }
 0x38d   : > { %v925_v42 = vpop.xlane.xlu2 %924 }
 0x38e   : > { %v926_v43 = vsub.f32 %v919_v15, %v925_v42  ;;  %v1251_v42 = vld [vmem:[#allocation10] sm:$0xff] }
 0x38f   : > { %1027 = vmatpush.bf16.msra.mxu1 %v1251_v42 }
 0x390   : > { %v927_v44 = vmul.f32 1.442695, %v926_v43 }
 0x392   : > { %1394 = vpow2.f32 %v927_v44 }
 0x393   : > { %823 = vrot.lane.b32.xlu1 %v1870_v13, %s1673_s26  ;;  %s1574_s26 = sshra.s32 %s1051_s13, 4  ;;  %s1575_s26 = int_to_ptr.hbm [resolvable:$true] %s1574_s26 }
 0x394   : > { %p1581_p10 = scmp.lt.s32.totalorder %s1575_s26, %s2028_s8 }
 0x395   : > { %v712_v47 = vpop.permute.xlu1 %711  ;;  %v656_v48 = vpop.permute.xlu2 %655 }
 0x396   : > { %v717_v49 = vsel %vm546_vm2, %v712_v47, 0  ;;  %v661_v51 = vsel %vm546_vm2, %v656_v48, 0 }
 0x397   : > { %670 = vmatpush.bf16.msrb.mxu2 %v661_v51  ;;  %726 = vmatpush.bf16.msra.mxu0 %v717_v49 }
 0x398   : > { %v1395_v52 = vpop.eup %1394 }
 0x399   : > { %v929_v54 = vsel %vm527_vm3, %v1395_v52, 0.0 }
 0x39a   : > { %930 = vadd.xlane.f32.xlu0 %v929_v54  ;;  %1223 = vmatmul.msk.bf16.vlgmr.msrb.gmra.mxu2 %vm527_vm3, %v654_v53 }
 0x39d   : > { %v768_v55 = vpop.permute.xlu1 %767 }
 0x39e   : > { %v773_v56 = vsel %vm546_vm2, %v768_v55, 0 }
 0x39f   : > { %782 = vmatpush.bf16.msra.mxu2 %v773_v56 }
 0x3a2   : > { %935 = vrot.lane.b32.xlu2 %v1870_v13, %s1674_s2  ;;  %s1576_s2 = scalar_lea.hbm %s1575_s26, 8 }
 0x3a3   : > { %p1577_p1 = scmp.ne.s32.totalorder %s1575_s26, %s1576_s2 }
 0x3a5   : > { %p1578_p3 = pnand %p1577_p1, %p1815_p4 }
 0x3a7   : > { %p1579_p9 = pneg %p1578_p3 }
 0x3ab   : > { %v763_v57 = vpop.xlane.xlu0 %762 }
 0x3ac   : > { %1396 = vrcp.f32 %v763_v57  ;;  %v1377_v57 = vld [vmem:[%s2027_s7] ss:$0 sm:$0xff] }
 0x3ad   : > { %1398 = vpow2.f32 %v871_v58 }
 0x3ae   : > { %879 = vrot.lane.b32.xlu0 %v1870_v13, %s1675_s4 }
 0x3b2   : > { %v1397_v59 = vpop.eup %1396 }
 0x3b3   : > { %v765_v60 = vmul.f32 %v1397_v59, %v1385_v21  ;;  %v1399_v62 = vpop.eup %1398 }
 0x3b4   : > { %v873_v63 = vsel %vm527_vm3, %v1399_v62, 0.0 }
 0x3b5   : > { %v766_v61 = vpack.c.bf16 %v765_v60, %v765_v60 }
 0x3b7   : > { %1227 = vmatmul.msk.bf16.vlgmr.msra.gmra.mxu2 %vm527_vm3, %v766_v61 }
 0x3bd   : > { %874 = vadd.xlane.f32.xlu1 %v873_v63 }
 0x3dd   : > { %v595_v1 = vpop.xlane.xlu1 %594 }
 0x3de   : > { %1400 = vrcp.f32 %v595_v1 }
 0x3e4   : > { %v1401_v2 = vpop.eup %1400 }
 0x3e5   : > { %v597_v3 = vmul.f32 %v1401_v2, %v1945_v27 }
 0x3e7   : > { %v598_v4 = vpack.c.bf16 %v597_v3, %v597_v3 }
 0x3e9   : > { %1221 = vmatmul.msk.bf16.vlgmr.msrb.gmra.mxu0 %vm527_vm3, %v598_v4 }
 0x3ed   : > { %v707_v13 = vpop.xlane.xlu1 %706 }
 0x3ee   : > { %1402 = vrcp.f32 %v707_v13 }
 0x3f4   : > { %v1403_v5 = vpop.eup %1402 }
 0x3f5   : > { %v709_v6 = vmul.f32 %v1403_v5, %v1389_v32 }
 0x3f7   : > { %v710_v7 = vpack.c.bf16 %v709_v6, %v709_v6 }
 0x3f9   : > { %1225 = vmatmul.msk.bf16.vlgmr.msra.gmra.mxu0 %vm527_vm3, %v710_v7 }
 0x3fd   : > { %v819_v8 = vpop.xlane.xlu2 %818 }
 0x3fe   : > { %1404 = vrcp.f32 %v819_v8 }
 0x404   : > { %v1405_v9 = vpop.eup %1404 }
 0x405   : > { %v821_v10 = vmul.f32 %v1405_v9, %v1391_v40  ;;  %v936_v11 = vpop.permute.xlu2 %935  ;;  %v824_v12 = vpop.permute.xlu1 %823 }
 0x406   : > { %v941_v14 = vsel %vm546_vm2, %v936_v11, 0  ;;  %v829_v15 = vsel %vm546_vm2, %v824_v12, 0 }
 0x407   : > { %v822_v16 = vpack.c.bf16 %v821_v10, %v821_v10  ;;  %838 = vmatpush.bf16.msrb.mxu0 %v829_v15 }
 0x40a   : > { %1229 = vmatmul.msk.bf16.vlgmr.msrb.gmra.mxu0 %vm527_vm3, %v822_v16 }
 0x40b   : > { %950 = vmatpush.bf16.msra.mxu0 %v941_v14 }
 0x40d   : > { %v931_v17 = vpop.xlane.xlu0 %930 }
 0x40e   : > { %1406 = vrcp.f32 %v931_v17 }
 0x414   : > { %v1407_v18 = vpop.eup %1406 }
 0x415   : > { %v933_v19 = vmul.f32 %v1407_v18, %v1395_v52 }
 0x417   : > { %v934_v20 = vpack.c.bf16 %v933_v19, %v933_v19 }
 0x41a   : > { %1233 = vmatmul.msk.bf16.vlgmr.msra.gmra.mxu0 %vm527_vm3, %v934_v20 }
 0x41d   : > { %v672_v21 = vpop.f32.mrf.mxu2 }
 0x41e   : > { %961 = vrot.lane.b32.xlu1 %v672_v21, %s1676_s27 }
 0x420   : > { %v880_v22 = vpop.permute.xlu0 %879 }
 0x421   : > { %v885_v23 = vsel %vm546_vm2, %v880_v22, 0 }
 0x422   : > { %894 = vmatpush.bf16.msrb.mxu2 %v885_v23 }
 0x425   : > { %v674_v24 = vpop.f32.mrf.mxu2 }
 0x430   : > { %v875_v25 = vpop.xlane.xlu1 %874 }
 0x431   : > { %1408 = vrcp.f32 %v875_v25 }
 0x437   : > { %v1409_v26 = vpop.eup %1408 }
 0x438   : > { %v877_v27 = vmul.f32 %v1409_v26, %v1399_v62 }
 0x43a   : > { %v878_v28 = vpack.c.bf16 %v877_v27, %v877_v27  ;;  %v784_v29 = vpop.f32.mrf.mxu2 }
 0x43b   : > { %969 = vrot.lane.b32.xlu2 %v784_v29, %s1677_s29  ;;  %s1580_s29 = scalar_lea.hbm %s2028_s8, 16 }
 0x43c   : > { %1231 = vmatmul.msk.bf16.vlgmr.msrb.gmra.mxu2 %vm527_vm3, %v878_v28  ;;  %p1582_p11 = scmp.lt.s32.totalorder %s1580_s29, %s1576_s2 }
 0x43e   : > { %p1583_p12 = por %p1582_p11, %p1581_p10 }
 0x440   : > { %p1584_p13 = pnand %p1583_p12, %p1579_p9 }
 0x442   : > { %v786_v30 = vpop.f32.mrf.mxu2 }
 0x466   : > { %v616_v31 = vpop.f32.mrf.mxu0 }
 0x467   : > { %957 = vrot.lane.b32.xlu0 %v616_v31, %s1678_s9 }
 0x46e   : > { %v618_v32 = vpop.f32.mrf.mxu0 }
 0x476   : > { %v728_v33 = vpop.f32.mrf.mxu0 }
 0x477   : > { %965 = vrot.lane.b32.xlu0 %v728_v33, %s1679_s11 }
 0x47e   : > { %v730_v34 = vpop.f32.mrf.mxu0 }
 0x487   : > { %v840_v35 = vpop.f32.mrf.mxu0 }
 0x488   : > { %973 = vrot.lane.b32.xlu0 %v840_v35, %s1680_s15 }
 0x48f   : > { %v842_v36 = vpop.f32.mrf.mxu0 }
 0x490   : > { %v962_v48 = vpop.permute.xlu1 %961 }
 0x495   : > { %v970_v45 = vpop.permute.xlu2 %969 }
 0x497   : > { %v952_v37 = vpop.f32.mrf.mxu0 }
 0x498   : > { %981 = vrot.lane.b32.xlu0 %v952_v37, %s1681_s17 }
 0x49f   : > { %v954_v38 = vpop.f32.mrf.mxu0 }
 0x4bf   : > { %v896_v39 = vpop.f32.mrf.mxu2 }
 0x4c0   : > { %977 = vrot.lane.b32.xlu2 %v896_v39, %s1682_s18 }
 0x4c7   : > { %v898_v40 = vpop.f32.mrf.mxu2 }
 0x4d9   : > { %v958_v43 = vpop.permute.xlu0 %957 }
 0x4da   : > { %v984_v46 = vsel %vm507_vm1, %v1929_v0, %v958_v43 }
 0x4db   : > { %v985_v49 = vsel %vm527_vm3, %v984_v46, %v962_v48 }
 0x4e9   : > { %v966_v44 = vpop.permute.xlu0 %965 }
 0x4ea   : > { %v987_v51 = vsel %vm986_vm4, %v985_v49, %v966_v44 }
 0x4eb   : > { %v989_v52 = vsel %vm988_vm5, %v987_v51, %v970_v45 }
 0x4fa   : > { %v974_v47 = vpop.permute.xlu0 %973 }
 0x4fb   : > { %v991_v53 = vsel %vm990_vm6, %v989_v52, %v974_v47 }
 0x50a   : > { %v982_v55 = vpop.permute.xlu0 %981 }
 0x51a   : > { %v978_v54 = vpop.permute.xlu2 %977 }
 0x51b   : > { %v993_v56 = vsel %vm992_vm7, %v991_v53, %v978_v54 }
 0x51c   : > { %v995_v50 = vsel %vm994_vm8, %v993_v56, %v982_v55 }
 0x51d   : > { %v996_v0 = vpack.c.bf16 %v995_v50, %v995_v50 }
 0x51f   : > { %1242 = vmatmul.msk.bf16.vlgmr.msra.gmra.mxu1 %vm451_vm0, %v996_v0 }
 0x59c   : > { %v1029_v58 = vpop.f32.mrf.mxu1 }
 0x59d   : > { %v1030_v59 = vadd.f32 %v1377_v57, %v1029_v58 }
 0x59f   : > { %1033 = vst.msk [vmem:[%s427_s16] sm:$0xff] %vm451_vm0, %v1030_v59 }
 0x5a0   : > { %1587 = shalt.err (!%p1584_p13)
}
 0x5a1   : > { %1269 = dma.vmem_to_hbm [thread:$0]  (%p1815_p4), %s1049_s6, 128, %s1051_s13, %s1035_s30  }
 0x5a4   : > { %v1031_v60 = vpop.f32.mrf.mxu1 }
 0x5a5 PF: > { %s2052_s21 = sld [smem:[#allocation17_spill]]  ;;  %p1289_p0 = pnand %p1188_p6, %p1823_p7 }
 0x5a7   : > { %p1290_p2 = pneg %p1289_p0 }
 0x5ab   : > { %s1062_s17 = sand.u32 1, %s2052_s21  }
 0x5ac   : > { %s1063_s18 = scalar_lea.sflag [#allocation4], %s1062_s17 }
 0x5ad   : > { %1629 = dma.done.wait (%p1290_p2), %s1063_s18, 128  }
 0x5ae   : > { %1631 = vsyncadd (%p1290_p2), %s1063_s18, 4294967168  ;;  %s28_s10 = sadd.s32 1, %s1654_s10   ;;  %s2054_s24 = sld [smem:[#allocation18_spill]] }
 0x5af   : > { %p25_p5 = scmp.ge.s32.totalorder %s28_s10, 4   ;;  %s2055_s29 = sld [smem:[#allocation21_spill]] }
 0x5b0   : > { %s2056_s30 = sld [smem:[#allocation19_spill]]  ;;  %s2058_s27 = smov %s1638_s28 }
 0x5b1   : > { %s2057_s9 = sld [smem:[#allocation20_spill]]  ;;  %27 = sbr.rel (!%p25_p5) target bundleno = 13 (0xd), region = 122 }
 0x5b4   : > { %s2059_s28 = smov %s2054_s24 }
 0x5b6   :  { %1069 = vsyncpa [#allocation3], 1 }
 0x5b7   :  { %1071 = vsyncpa [#allocation3 + $0x1], 1 }
 0x5b8   :  { %1072 = vsyncpa [#allocation6], 1 }
 0x5b9   :  { %1074 = vsyncpa [#allocation6 + $0x1], 1 }
 0x5ba   :  { %1075 = vsyncpa [#allocation9], 1 }
 0x5bb   :  { %1076 = vsyncpa [#allocation4], 1 }
 0x5bc   :  { %1078 = vsyncpa [#allocation4 + $0x1], 1 }

</bundles_post_ra>
